<compile_context>
chip_gen: v7x
topology: tpu7x:2x2x1
jax: 0.10.0
libtpu: 0.0.40
codegen_flags: <defaults>
</compile_context>

<pallas_src>
import jax
import jax.numpy as jnp
from jax import lax
from jax.experimental import pallas as pl
from jax.experimental.pallas import tpu as pltpu

HIDDEN = 32
NUM_HEADS = 4
INTERMEDIATE = 64
LN_EPS = 1e-5  # nn.LayerNorm default

# Rows of the packed "vecs" array (biases + LayerNorm params), width = max(3H, I).
(R_SA_BQKV, R_CA_BKV, R_FFN_B1, R_SA_BO, R_CA_BQ, R_CA_BO, R_FFN_B2,
 R_LN1_G, R_LN1_B, R_LN2_G, R_LN2_B, R_LN3_G, R_LN3_B) = range(13)
VEC_ROWS = 16
VEC_W = max(3 * HIDDEN, INTERMEDIATE)


# ---------------------------------------------------------------------------
# Fused decoder-layer kernel (whole batch per grid step)
# ---------------------------------------------------------------------------
def decoder_layer_kernel(
    dec_ref, enc_ref, sbias_ref, cbias_ref,
    sa_wqkv_ref, sa_wo_ref,
    ca_wq_ref, ca_wkv_ref, ca_wo_ref,
    ffn_w1_ref, ffn_w2_ref,
    vec_ref, out_ref,
):
    H, I = HIDDEN, INTERMEDIATE
    dk = H // NUM_HEADS

    def vec(row, width):
        return vec_ref[row:row + 1, :width]          # (1, width) f32

    def layer_norm(x, g_row, b_row):
        g = vec(g_row, H)
        b = vec(b_row, H)
        mean = jnp.mean(x, axis=-1, keepdims=True)
        c = x - mean
        var = jnp.mean(c * c, axis=-1, keepdims=True)
        return c * lax.rsqrt(var + LN_EPS) * g + b

    def mha_core(q, kv, bias, wo_ref, bo):
        # q: (M, H) f32, kv: (N, 2H) f32 (k | v), bias: (M, N) additive f32,
        # wo_ref: (nh, dk, H) bf16 ref, bo: (1, H) f32.
        m = q.shape[0]
        scale = dk ** -0.5
        out = jnp.zeros((m, H), jnp.float32)
        for h in range(NUM_HEADS):                   # static unrolled loop
            q_h = q[:, h * dk:(h + 1) * dk].astype(jnp.bfloat16)
            k_h = kv[:, h * dk:(h + 1) * dk].astype(jnp.bfloat16)
            v_h = kv[:, H + h * dk:H + (h + 1) * dk].astype(jnp.bfloat16)
            # scores = q_h @ k_h^T (no explicit transpose), f32 accumulation
            s = lax.dot_general(q_h, k_h, (((1,), (1,)), ((), ())),
                                preferred_element_type=jnp.float32) * scale + bias
            s = s - jnp.max(s, axis=-1, keepdims=True)
            p = jnp.exp(s)
            p = p * pl.reciprocal(jnp.sum(p, axis=-1, keepdims=True), approx=True)
            ctx = jnp.dot(p.astype(jnp.bfloat16), v_h,
                          preferred_element_type=jnp.float32)      # (M, dk)
            out = out + jnp.dot(ctx.astype(jnp.bfloat16), wo_ref[h],
                                preferred_element_type=jnp.float32)  # (M, H)
        return out + bo

    dec = dec_ref[...]                               # (B*Sq, H) f32
    enc = enc_ref[...]                               # (B*Sk, H) f32

    # --- self attention + residual + LN1 (dropout1 = identity) ---
    qkv = jnp.dot(dec.astype(jnp.bfloat16), sa_wqkv_ref[...],
                  preferred_element_type=jnp.float32) + vec(R_SA_BQKV, 3 * H)
    x = mha_core(qkv[:, :H], qkv[:, H:], sbias_ref[...], sa_wo_ref,
                 vec(R_SA_BO, H))
    x = layer_norm(x + dec, R_LN1_G, R_LN1_B)

    # --- encoder-decoder attention + residual + LN2 (dropout2 = identity) ---
    q = jnp.dot(x.astype(jnp.bfloat16), ca_wq_ref[...],
                preferred_element_type=jnp.float32) + vec(R_CA_BQ, H)
    kv = jnp.dot(enc.astype(jnp.bfloat16), ca_wkv_ref[...],
                 preferred_element_type=jnp.float32) + vec(R_CA_BKV, 2 * H)
    y = mha_core(q, kv, cbias_ref[...], ca_wo_ref, vec(R_CA_BO, H))
    x = layer_norm(y + x, R_LN2_G, R_LN2_B)

    # --- feed-forward + residual + LN3 (dropout3 = identity) ---
    h1 = jnp.dot(x.astype(jnp.bfloat16), ffn_w1_ref[...],
                 preferred_element_type=jnp.float32) + vec(R_FFN_B1, I)
    h1 = jnp.maximum(h1, 0.0)
    y = jnp.dot(h1.astype(jnp.bfloat16), ffn_w2_ref[...],
                preferred_element_type=jnp.float32) + vec(R_FFN_B2, H)
    x = layer_norm(y + x, R_LN3_G, R_LN3_B)

    out_ref[...] = x.astype(out_ref.dtype)           # single (B*Sq, H) slab store


# ---------------------------------------------------------------------------
# Wrapper: parameter packing, mask -> block-diagonal additive bias, pallas_call
# ---------------------------------------------------------------------------
def _block_diag_bias(mask):
    """(B, Sq, Sk) keep-mask -> (B*Sq, B*Sk) additive bias (0 keep, -1e9 drop /
    cross-batch)."""
    B, Sq, Sk = mask.shape
    rows = jnp.repeat(jnp.arange(B), Sq)
    cols = jnp.repeat(jnp.arange(B), Sk)
    q_idx = jnp.arange(B * Sq) % Sq
    k_idx = jnp.arange(B * Sk) % Sk
    vals = mask[rows[:, None], q_idx[:, None], k_idx[None, :]]
    keep = (rows[:, None] == cols[None, :]) & (vals > 0)
    return jnp.where(keep, 0.0, jnp.float32(-1e9)).astype(jnp.float32)


def _pack_params(p):
    (sa_wq, sa_bq, sa_wk, sa_bk, sa_wv, sa_bv, sa_wo, sa_bo,
     ln1_g, ln1_b,
     ca_wq, ca_bq, ca_wk, ca_bk, ca_wv, ca_bv, ca_wo, ca_bo,
     ln2_g, ln2_b,
     ffn_w1, ffn_b1, ffn_w2, ffn_b2,
     ln3_g, ln3_b) = p
    H, nh = HIDDEN, NUM_HEADS
    dk = H // nh

    sa_wqkv = jnp.concatenate([sa_wq, sa_wk, sa_wv], axis=1).astype(jnp.bfloat16)
    ca_wkv = jnp.concatenate([ca_wk, ca_wv], axis=1).astype(jnp.bfloat16)
    sa_wo_h = sa_wo.reshape(nh, dk, H).astype(jnp.bfloat16)
    ca_wo_h = ca_wo.reshape(nh, dk, H).astype(jnp.bfloat16)

    def row(v):
        v = jnp.asarray(v, jnp.float32).reshape(-1)
        return jnp.pad(v, (0, VEC_W - v.shape[0]))

    rows = [
        row(jnp.concatenate([sa_bq.reshape(-1), sa_bk.reshape(-1),
                             sa_bv.reshape(-1)])),                 # R_SA_BQKV
        row(jnp.concatenate([ca_bk.reshape(-1), ca_bv.reshape(-1)])),  # R_CA_BKV
        row(ffn_b1), row(sa_bo), row(ca_bq), row(ca_bo), row(ffn_b2),
        row(ln1_g), row(ln1_b), row(ln2_g), row(ln2_b), row(ln3_g), row(ln3_b),
    ]
    rows += [jnp.zeros((VEC_W,), jnp.float32)] * (VEC_ROWS - len(rows))
    vecs = jnp.stack(rows, axis=0)                                 # (16, VEC_W) f32

    weights = [sa_wqkv, sa_wo_h,
               ca_wq.astype(jnp.bfloat16), ca_wkv, ca_wo_h,
               ffn_w1.astype(jnp.bfloat16), ffn_w2.astype(jnp.bfloat16)]
    return weights, vecs


def transformer_decoder_layer(dec, enc, trg_mask, src_mask, params):
    B, Sq, H = dec.shape
    Sk = enc.shape[1]

    dec2d = dec.reshape(B * Sq, H).astype(jnp.float32)
    enc2d = enc.reshape(B * Sk, H).astype(jnp.float32)
    self_bias = _block_diag_bias(trg_mask)     # (B*Sq, B*Sq)
    cross_bias = _block_diag_bias(src_mask)    # (B*Sq, B*Sk)
    weights, vecs = _pack_params(params)

    operands = [dec2d, enc2d, self_bias, cross_bias] + weights + [vecs]

    def full_spec(a):
        zeros = (0,) * a.ndim
        return pl.BlockSpec(a.shape, lambda i, _z=zeros: _z)

    out2d = pl.pallas_call(
        decoder_layer_kernel,
        out_shape=jax.ShapeDtypeStruct((B * Sq, H), jnp.float32),
        grid=(1,),
        in_specs=[full_spec(a) for a in operands],
        out_specs=pl.BlockSpec((B * Sq, H), lambda i: (0, 0)),
        compiler_params=pltpu.CompilerParams(
            dimension_semantics=("arbitrary",)),
    )(*operands)

    return out2d.reshape(B, Sq, H)


# ---------------------------------------------------------------------------
# Pure-JAX reference (f32, PyTorch-equivalent semantics) for a sanity check
# ---------------------------------------------------------------------------
def _ref_mha(xq, xkv, mask, wq, bq, wk, bk, wv, bv, wo, bo):
    B, Sq, H = xq.shape
    dk = H // NUM_HEADS
    q = (xq @ wq + bq).reshape(B, Sq, NUM_HEADS, dk).transpose(0, 2, 1, 3)
    k = (xkv @ wk + bk).reshape(B, -1, NUM_HEADS, dk).transpose(0, 2, 1, 3)
    v = (xkv @ wv + bv).reshape(B, -1, NUM_HEADS, dk).transpose(0, 2, 1, 3)
    s = jnp.einsum("bhqd,bhkd->bhqk", q, k) / jnp.sqrt(jnp.float32(dk))
    s = jnp.where(mask[:, None, :, :] == 0, -1e9, s)
    p = jax.nn.softmax(s, axis=-1)
    ctx = jnp.einsum("bhqk,bhkd->bhqd", p, v).transpose(0, 2, 1, 3).reshape(B, Sq, H)
    return ctx @ wo + bo


def _ref_ln(x, g, b):
    m = x.mean(-1, keepdims=True)
    v = ((x - m) ** 2).mean(-1, keepdims=True)
    return (x - m) * lax.rsqrt(v + LN_EPS) * g + b


def reference(dec, enc, trg_mask, src_mask, p):
    (sa_wq, sa_bq, sa_wk, sa_bk, sa_wv, sa_bv, sa_wo, sa_bo,
     ln1_g, ln1_b,
     ca_wq, ca_bq, ca_wk, ca_bk, ca_wv, ca_bv, ca_wo, ca_bo,
     ln2_g, ln2_b,
     ffn_w1, ffn_b1, ffn_w2, ffn_b2,
     ln3_g, ln3_b) = p
    x = _ref_mha(dec, dec, trg_mask, sa_wq, sa_bq, sa_wk, sa_bk,
                 sa_wv, sa_bv, sa_wo, sa_bo)
    x = _ref_ln(x + dec, ln1_g, ln1_b)
    r = x
    x = _ref_mha(x, enc, src_mask, ca_wq, ca_bq, ca_wk, ca_bk,
                 ca_wv, ca_bv, ca_wo, ca_bo)
    x = _ref_ln(x + r, ln2_g, ln2_b)
    r = x
    x = jnp.maximum(x @ ffn_w1 + ffn_b1, 0.0) @ ffn_w2 + ffn_b2
    return _ref_ln(x + r, ln3_g, ln3_b)


# ---------------------------------------------------------------------------
# Main
# ---------------------------------------------------------------------------
def make_params(key):
    H, I = HIDDEN, INTERMEDIATE
    keys = jax.random.split(key, 16)
    ki = iter(keys)

    def w(shape):
        return (0.02 * jax.random.normal(next(ki), shape)).astype(jnp.float32)

    def b(n):
        return jnp.zeros((1, n), jnp.float32)

    params = []
    for _ in range(2):  # self_attn, enc_dec_attn
        params += [w((H, H)), b(H), w((H, H)), b(H),
                   w((H, H)), b(H), w((H, H)), b(H)]
        params += [jnp.ones((1, H), jnp.float32), jnp.zeros((1, H), jnp.float32)]  # LN
    params += [w((H, I)), b(I), w((I, H)), b(H)]                                   # FFN
    params += [jnp.ones((1, H), jnp.float32), jnp.zeros((1, H), jnp.float32)]      # LN3
    return params


if __name__ == "__main__":
    B, Sq, Sk, H = 2, 8, 8, HIDDEN
    key = jax.random.PRNGKey(0)
    k_dec, k_enc, k_p = jax.random.split(key, 3)

    dec = jax.random.normal(k_dec, (B, Sq, H), jnp.float32)
    enc = jax.random.normal(k_enc, (B, Sk, H), jnp.float32)
    # causal target mask, all-ones source mask (1 = keep)
    trg_mask = jnp.tril(jnp.ones((Sq, Sq), jnp.float32))[None].repeat(B, axis=0)
    src_mask = jnp.ones((B, Sq, Sk), jnp.float32)

    params = make_params(k_p)

    out = transformer_decoder_layer(dec, enc, trg_mask, src_mask, params)
    out = jax.block_until_ready(out)

    ref = reference(dec, enc, trg_mask, src_mask, params)
    assert out.shape == (B, Sq, H)
    # Tolerance accounts for bf16 MXU inputs (f32 accumulation) in the kernel.
    assert jnp.allclose(out, ref, atol=2e-2, rtol=2e-2), "mismatch vs reference"
    print("KERNEL_OK")
</pallas_src>

<mosaic_0001>
module attributes {stable_mosaic.version = 11 : i64} {
  func.func @decoder_layer_kernel(%arg0: i32, %arg1: memref<16x32xf32, #tpu.memory_space<vmem>>, %arg2: memref<16x32xf32, #tpu.memory_space<vmem>>, %arg3: memref<16x16xf32, #tpu.memory_space<vmem>>, %arg4: memref<16x16xf32, #tpu.memory_space<vmem>>, %arg5: memref<32x96xbf16, #tpu.memory_space<vmem>>, %arg6: memref<4x8x32xbf16, #tpu.memory_space<vmem>>, %arg7: memref<32x32xbf16, #tpu.memory_space<vmem>>, %arg8: memref<32x64xbf16, #tpu.memory_space<vmem>>, %arg9: memref<4x8x32xbf16, #tpu.memory_space<vmem>>, %arg10: memref<32x64xbf16, #tpu.memory_space<vmem>>, %arg11: memref<64x32xbf16, #tpu.memory_space<vmem>>, %arg12: memref<16x96xf32, #tpu.memory_space<vmem>>, %arg13: memref<16x32xf32, #tpu.memory_space<vmem>>) attributes {dimension_semantics = [#tpu.dimension_semantics<arbitrary>], iteration_bounds = array<i64: 1>, scalar_prefetch = 0 : i64, scratch_operands = 0 : i64, tpu.core_type = #tpu.core_type<tc>, window_params = [{pipeline_mode = #tpu.pipeline_mode<synchronous>, transform_indices = @transform_0, window_bounds = array<i64: 16, 32>}, {pipeline_mode = #tpu.pipeline_mode<synchronous>, transform_indices = @transform_1, window_bounds = array<i64: 16, 32>}, {pipeline_mode = #tpu.pipeline_mode<synchronous>, transform_indices = @transform_2, window_bounds = array<i64: 16, 16>}, {pipeline_mode = #tpu.pipeline_mode<synchronous>, transform_indices = @transform_3, window_bounds = array<i64: 16, 16>}, {pipeline_mode = #tpu.pipeline_mode<synchronous>, transform_indices = @transform_4, window_bounds = array<i64: 32, 96>}, {pipeline_mode = #tpu.pipeline_mode<synchronous>, transform_indices = @transform_5, window_bounds = array<i64: 4, 8, 32>}, {pipeline_mode = #tpu.pipeline_mode<synchronous>, transform_indices = @transform_6, window_bounds = array<i64: 32, 32>}, {pipeline_mode = #tpu.pipeline_mode<synchronous>, transform_indices = @transform_7, window_bounds = array<i64: 32, 64>}, {pipeline_mode = #tpu.pipeline_mode<synchronous>, transform_indices = @transform_8, window_bounds = array<i64: 4, 8, 32>}, {pipeline_mode = #tpu.pipeline_mode<synchronous>, transform_indices = @transform_9, window_bounds = array<i64: 32, 64>}, {pipeline_mode = #tpu.pipeline_mode<synchronous>, transform_indices = @transform_10, window_bounds = array<i64: 64, 32>}, {pipeline_mode = #tpu.pipeline_mode<synchronous>, transform_indices = @transform_11, window_bounds = array<i64: 16, 96>}, {pipeline_mode = #tpu.pipeline_mode<synchronous>, transform_indices = @transform_12, window_bounds = array<i64: 16, 32>}]} {
    %c0 = arith.constant 0 : index
    %c0_0 = arith.constant 0 : index
    %0 = vector.load %arg1[%c0, %c0_0] : memref<16x32xf32, #tpu.memory_space<vmem>>, vector<16x32xf32>
    %c0_1 = arith.constant 0 : index
    %c0_2 = arith.constant 0 : index
    %1 = vector.load %arg2[%c0_1, %c0_2] : memref<16x32xf32, #tpu.memory_space<vmem>>, vector<16x32xf32>
    %2 = arith.truncf %0 : vector<16x32xf32> to vector<16x32xbf16>
    %c0_3 = arith.constant 0 : index
    %c0_4 = arith.constant 0 : index
    %3 = vector.load %arg5[%c0_3, %c0_4] : memref<32x96xbf16, #tpu.memory_space<vmem>>, vector<32x96xbf16>
    %cst = arith.constant dense<0.000000e+00> : vector<16x96xf32>
    %4 = tpu.matmul %2, %3, %cst {dimension_numbers = #tpu.dot_dimension_numbers<[1], [0], [0], [1], [0, 0, 1, 1], [], []>} : vector<16x32xbf16>, vector<32x96xbf16>, vector<16x96xf32> -> vector<16x96xf32>
    %c0_5 = arith.constant 0 : index
    %c0_6 = arith.constant 0 : index
    %5 = vector.load %arg12[%c0_5, %c0_6] : memref<16x96xf32, #tpu.memory_space<vmem>>, vector<1x96xf32>
    %6 = vector.broadcast %5 : vector<1x96xf32> to vector<16x96xf32>
    %7 = arith.addf %4, %6 : vector<16x96xf32>
    %8 = vector.extract_strided_slice %7 {offsets = [0, 0], sizes = [16, 32], strides = [1, 1]} : vector<16x96xf32> to vector<16x32xf32>
    %9 = vector.extract_strided_slice %7 {offsets = [0, 32], sizes = [16, 64], strides = [1, 1]} : vector<16x96xf32> to vector<16x64xf32>
    %c0_7 = arith.constant 0 : index
    %c0_8 = arith.constant 0 : index
    %10 = vector.load %arg3[%c0_7, %c0_8] : memref<16x16xf32, #tpu.memory_space<vmem>>, vector<16x16xf32>
    %c3 = arith.constant 3 : index
    %c0_9 = arith.constant 0 : index
    %11 = vector.load %arg12[%c3, %c0_9] : memref<16x96xf32, #tpu.memory_space<vmem>>, vector<1x32xf32>
    %cst_10 = arith.constant 0.000000e+00 : f32
    %12 = vector.broadcast %cst_10 : f32 to vector<16x32xf32>
    %13 = vector.extract_strided_slice %8 {offsets = [0, 0], sizes = [16, 8], strides = [1, 1]} : vector<16x32xf32> to vector<16x8xf32>
    %14 = arith.truncf %13 : vector<16x8xf32> to vector<16x8xbf16>
    %15 = vector.extract_strided_slice %9 {offsets = [0, 0], sizes = [16, 8], strides = [1, 1]} : vector<16x64xf32> to vector<16x8xf32>
    %16 = arith.truncf %15 : vector<16x8xf32> to vector<16x8xbf16>
    %17 = vector.extract_strided_slice %9 {offsets = [0, 32], sizes = [16, 8], strides = [1, 1]} : vector<16x64xf32> to vector<16x8xf32>
    %18 = arith.truncf %17 : vector<16x8xf32> to vector<16x8xbf16>
    %cst_11 = arith.constant dense<0.000000e+00> : vector<16x16xf32>
    %19 = tpu.matmul %14, %16, %cst_11 {dimension_numbers = #tpu.dot_dimension_numbers<[1], [1], [0], [0], [0, 0, 1, 0], [], []>} : vector<16x8xbf16>, vector<16x8xbf16>, vector<16x16xf32> -> vector<16x16xf32>
    %cst_12 = arith.constant 0.353553385 : f32
    %20 = vector.broadcast %cst_12 : f32 to vector<16x16xf32>
    %21 = arith.mulf %19, %20 : vector<16x16xf32>
    %22 = arith.addf %21, %10 : vector<16x16xf32>
    %cst_13 = arith.constant dense<0xFF800000> : vector<16xf32>
    %23 = vector.multi_reduction <maximumf>, %22, %cst_13 [1] : vector<16x16xf32> to vector<16xf32>
    %24 = vector.shape_cast %23 : vector<16xf32> to vector<16x1xf32>
    %25 = vector.broadcast %24 : vector<16x1xf32> to vector<16x16xf32>
    %26 = arith.subf %22, %25 : vector<16x16xf32>
    %27 = math.exp %26 : vector<16x16xf32>
    %cst_14 = arith.constant dense<0.000000e+00> : vector<16xf32>
    %28 = vector.multi_reduction <add>, %27, %cst_14 [1] : vector<16x16xf32> to vector<16xf32>
    %29 = vector.shape_cast %28 : vector<16xf32> to vector<16x1xf32>
    %30 = tpu.reciprocal %29 {approx = true} : vector<16x1xf32> -> vector<16x1xf32>
    %31 = vector.broadcast %30 : vector<16x1xf32> to vector<16x16xf32>
    %32 = arith.mulf %27, %31 : vector<16x16xf32>
    %33 = arith.truncf %32 : vector<16x16xf32> to vector<16x16xbf16>
    %cst_15 = arith.constant dense<0.000000e+00> : vector<16x8xf32>
    %34 = tpu.matmul %33, %18, %cst_15 {dimension_numbers = #tpu.dot_dimension_numbers<[1], [0], [0], [1], [0, 0, 1, 1], [], []>} : vector<16x16xbf16>, vector<16x8xbf16>, vector<16x8xf32> -> vector<16x8xf32>
    %35 = arith.truncf %34 : vector<16x8xf32> to vector<16x8xbf16>
    %c0_16 = arith.constant 0 : index
    %c0_17 = arith.constant 0 : index
    %c0_18 = arith.constant 0 : index
    %36 = vector.load %arg6[%c0_16, %c0_17, %c0_18] : memref<4x8x32xbf16, #tpu.memory_space<vmem>>, vector<1x8x32xbf16>
    %37 = vector.shape_cast %36 : vector<1x8x32xbf16> to vector<8x32xbf16>
    %cst_19 = arith.constant dense<0.000000e+00> : vector<16x32xf32>
    %38 = tpu.matmul %35, %37, %cst_19 {dimension_numbers = #tpu.dot_dimension_numbers<[1], [0], [0], [1], [0, 0, 1, 1], [], []>} : vector<16x8xbf16>, vector<8x32xbf16>, vector<16x32xf32> -> vector<16x32xf32>
    %39 = arith.addf %12, %38 : vector<16x32xf32>
    %40 = vector.extract_strided_slice %8 {offsets = [0, 8], sizes = [16, 8], strides = [1, 1]} : vector<16x32xf32> to vector<16x8xf32>
    %41 = arith.truncf %40 : vector<16x8xf32> to vector<16x8xbf16>
    %42 = vector.extract_strided_slice %9 {offsets = [0, 8], sizes = [16, 8], strides = [1, 1]} : vector<16x64xf32> to vector<16x8xf32>
    %43 = arith.truncf %42 : vector<16x8xf32> to vector<16x8xbf16>
    %44 = vector.extract_strided_slice %9 {offsets = [0, 40], sizes = [16, 8], strides = [1, 1]} : vector<16x64xf32> to vector<16x8xf32>
    %45 = arith.truncf %44 : vector<16x8xf32> to vector<16x8xbf16>
    %cst_20 = arith.constant dense<0.000000e+00> : vector<16x16xf32>
    %46 = tpu.matmul %41, %43, %cst_20 {dimension_numbers = #tpu.dot_dimension_numbers<[1], [1], [0], [0], [0, 0, 1, 0], [], []>} : vector<16x8xbf16>, vector<16x8xbf16>, vector<16x16xf32> -> vector<16x16xf32>
    %cst_21 = arith.constant 0.353553385 : f32
    %47 = vector.broadcast %cst_21 : f32 to vector<16x16xf32>
    %48 = arith.mulf %46, %47 : vector<16x16xf32>
    %49 = arith.addf %48, %10 : vector<16x16xf32>
    %cst_22 = arith.constant dense<0xFF800000> : vector<16xf32>
    %50 = vector.multi_reduction <maximumf>, %49, %cst_22 [1] : vector<16x16xf32> to vector<16xf32>
    %51 = vector.shape_cast %50 : vector<16xf32> to vector<16x1xf32>
    %52 = vector.broadcast %51 : vector<16x1xf32> to vector<16x16xf32>
    %53 = arith.subf %49, %52 : vector<16x16xf32>
    %54 = math.exp %53 : vector<16x16xf32>
    %cst_23 = arith.constant dense<0.000000e+00> : vector<16xf32>
    %55 = vector.multi_reduction <add>, %54, %cst_23 [1] : vector<16x16xf32> to vector<16xf32>
    %56 = vector.shape_cast %55 : vector<16xf32> to vector<16x1xf32>
    %57 = tpu.reciprocal %56 {approx = true} : vector<16x1xf32> -> vector<16x1xf32>
    %58 = vector.broadcast %57 : vector<16x1xf32> to vector<16x16xf32>
    %59 = arith.mulf %54, %58 : vector<16x16xf32>
    %60 = arith.truncf %59 : vector<16x16xf32> to vector<16x16xbf16>
    %cst_24 = arith.constant dense<0.000000e+00> : vector<16x8xf32>
    %61 = tpu.matmul %60, %45, %cst_24 {dimension_numbers = #tpu.dot_dimension_numbers<[1], [0], [0], [1], [0, 0, 1, 1], [], []>} : vector<16x16xbf16>, vector<16x8xbf16>, vector<16x8xf32> -> vector<16x8xf32>
    %62 = arith.truncf %61 : vector<16x8xf32> to vector<16x8xbf16>
    %c1 = arith.constant 1 : index
    %c0_25 = arith.constant 0 : index
    %c0_26 = arith.constant 0 : index
    %63 = vector.load %arg6[%c1, %c0_25, %c0_26] : memref<4x8x32xbf16, #tpu.memory_space<vmem>>, vector<1x8x32xbf16>
    %64 = vector.shape_cast %63 : vector<1x8x32xbf16> to vector<8x32xbf16>
    %cst_27 = arith.constant dense<0.000000e+00> : vector<16x32xf32>
    %65 = tpu.matmul %62, %64, %cst_27 {dimension_numbers = #tpu.dot_dimension_numbers<[1], [0], [0], [1], [0, 0, 1, 1], [], []>} : vector<16x8xbf16>, vector<8x32xbf16>, vector<16x32xf32> -> vector<16x32xf32>
    %66 = arith.addf %39, %65 : vector<16x32xf32>
    %67 = vector.extract_strided_slice %8 {offsets = [0, 16], sizes = [16, 8], strides = [1, 1]} : vector<16x32xf32> to vector<16x8xf32>
    %68 = arith.truncf %67 : vector<16x8xf32> to vector<16x8xbf16>
    %69 = vector.extract_strided_slice %9 {offsets = [0, 16], sizes = [16, 8], strides = [1, 1]} : vector<16x64xf32> to vector<16x8xf32>
    %70 = arith.truncf %69 : vector<16x8xf32> to vector<16x8xbf16>
    %71 = vector.extract_strided_slice %9 {offsets = [0, 48], sizes = [16, 8], strides = [1, 1]} : vector<16x64xf32> to vector<16x8xf32>
    %72 = arith.truncf %71 : vector<16x8xf32> to vector<16x8xbf16>
    %cst_28 = arith.constant dense<0.000000e+00> : vector<16x16xf32>
    %73 = tpu.matmul %68, %70, %cst_28 {dimension_numbers = #tpu.dot_dimension_numbers<[1], [1], [0], [0], [0, 0, 1, 0], [], []>} : vector<16x8xbf16>, vector<16x8xbf16>, vector<16x16xf32> -> vector<16x16xf32>
    %cst_29 = arith.constant 0.353553385 : f32
    %74 = vector.broadcast %cst_29 : f32 to vector<16x16xf32>
    %75 = arith.mulf %73, %74 : vector<16x16xf32>
    %76 = arith.addf %75, %10 : vector<16x16xf32>
    %cst_30 = arith.constant dense<0xFF800000> : vector<16xf32>
    %77 = vector.multi_reduction <maximumf>, %76, %cst_30 [1] : vector<16x16xf32> to vector<16xf32>
    %78 = vector.shape_cast %77 : vector<16xf32> to vector<16x1xf32>
    %79 = vector.broadcast %78 : vector<16x1xf32> to vector<16x16xf32>
    %80 = arith.subf %76, %79 : vector<16x16xf32>
    %81 = math.exp %80 : vector<16x16xf32>
    %cst_31 = arith.constant dense<0.000000e+00> : vector<16xf32>
    %82 = vector.multi_reduction <add>, %81, %cst_31 [1] : vector<16x16xf32> to vector<16xf32>
    %83 = vector.shape_cast %82 : vector<16xf32> to vector<16x1xf32>
    %84 = tpu.reciprocal %83 {approx = true} : vector<16x1xf32> -> vector<16x1xf32>
    %85 = vector.broadcast %84 : vector<16x1xf32> to vector<16x16xf32>
    %86 = arith.mulf %81, %85 : vector<16x16xf32>
    %87 = arith.truncf %86 : vector<16x16xf32> to vector<16x16xbf16>
    %cst_32 = arith.constant dense<0.000000e+00> : vector<16x8xf32>
    %88 = tpu.matmul %87, %72, %cst_32 {dimension_numbers = #tpu.dot_dimension_numbers<[1], [0], [0], [1], [0, 0, 1, 1], [], []>} : vector<16x16xbf16>, vector<16x8xbf16>, vector<16x8xf32> -> vector<16x8xf32>
    %89 = arith.truncf %88 : vector<16x8xf32> to vector<16x8xbf16>
    %c2 = arith.constant 2 : index
    %c0_33 = arith.constant 0 : index
    %c0_34 = arith.constant 0 : index
    %90 = vector.load %arg6[%c2, %c0_33, %c0_34] : memref<4x8x32xbf16, #tpu.memory_space<vmem>>, vector<1x8x32xbf16>
    %91 = vector.shape_cast %90 : vector<1x8x32xbf16> to vector<8x32xbf16>
    %cst_35 = arith.constant dense<0.000000e+00> : vector<16x32xf32>
    %92 = tpu.matmul %89, %91, %cst_35 {dimension_numbers = #tpu.dot_dimension_numbers<[1], [0], [0], [1], [0, 0, 1, 1], [], []>} : vector<16x8xbf16>, vector<8x32xbf16>, vector<16x32xf32> -> vector<16x32xf32>
    %93 = arith.addf %66, %92 : vector<16x32xf32>
    %94 = vector.extract_strided_slice %8 {offsets = [0, 24], sizes = [16, 8], strides = [1, 1]} : vector<16x32xf32> to vector<16x8xf32>
    %95 = arith.truncf %94 : vector<16x8xf32> to vector<16x8xbf16>
    %96 = vector.extract_strided_slice %9 {offsets = [0, 24], sizes = [16, 8], strides = [1, 1]} : vector<16x64xf32> to vector<16x8xf32>
    %97 = arith.truncf %96 : vector<16x8xf32> to vector<16x8xbf16>
    %98 = vector.extract_strided_slice %9 {offsets = [0, 56], sizes = [16, 8], strides = [1, 1]} : vector<16x64xf32> to vector<16x8xf32>
    %99 = arith.truncf %98 : vector<16x8xf32> to vector<16x8xbf16>
    %cst_36 = arith.constant dense<0.000000e+00> : vector<16x16xf32>
    %100 = tpu.matmul %95, %97, %cst_36 {dimension_numbers = #tpu.dot_dimension_numbers<[1], [1], [0], [0], [0, 0, 1, 0], [], []>} : vector<16x8xbf16>, vector<16x8xbf16>, vector<16x16xf32> -> vector<16x16xf32>
    %cst_37 = arith.constant 0.353553385 : f32
    %101 = vector.broadcast %cst_37 : f32 to vector<16x16xf32>
    %102 = arith.mulf %100, %101 : vector<16x16xf32>
    %103 = arith.addf %102, %10 : vector<16x16xf32>
    %cst_38 = arith.constant dense<0xFF800000> : vector<16xf32>
    %104 = vector.multi_reduction <maximumf>, %103, %cst_38 [1] : vector<16x16xf32> to vector<16xf32>
    %105 = vector.shape_cast %104 : vector<16xf32> to vector<16x1xf32>
    %106 = vector.broadcast %105 : vector<16x1xf32> to vector<16x16xf32>
    %107 = arith.subf %103, %106 : vector<16x16xf32>
    %108 = math.exp %107 : vector<16x16xf32>
    %cst_39 = arith.constant dense<0.000000e+00> : vector<16xf32>
    %109 = vector.multi_reduction <add>, %108, %cst_39 [1] : vector<16x16xf32> to vector<16xf32>
    %110 = vector.shape_cast %109 : vector<16xf32> to vector<16x1xf32>
    %111 = tpu.reciprocal %110 {approx = true} : vector<16x1xf32> -> vector<16x1xf32>
    %112 = vector.broadcast %111 : vector<16x1xf32> to vector<16x16xf32>
    %113 = arith.mulf %108, %112 : vector<16x16xf32>
    %114 = arith.truncf %113 : vector<16x16xf32> to vector<16x16xbf16>
    %cst_40 = arith.constant dense<0.000000e+00> : vector<16x8xf32>
    %115 = tpu.matmul %114, %99, %cst_40 {dimension_numbers = #tpu.dot_dimension_numbers<[1], [0], [0], [1], [0, 0, 1, 1], [], []>} : vector<16x16xbf16>, vector<16x8xbf16>, vector<16x8xf32> -> vector<16x8xf32>
    %116 = arith.truncf %115 : vector<16x8xf32> to vector<16x8xbf16>
    %c3_41 = arith.constant 3 : index
    %c0_42 = arith.constant 0 : index
    %c0_43 = arith.constant 0 : index
    %117 = vector.load %arg6[%c3_41, %c0_42, %c0_43] : memref<4x8x32xbf16, #tpu.memory_space<vmem>>, vector<1x8x32xbf16>
    %118 = vector.shape_cast %117 : vector<1x8x32xbf16> to vector<8x32xbf16>
    %cst_44 = arith.constant dense<0.000000e+00> : vector<16x32xf32>
    %119 = tpu.matmul %116, %118, %cst_44 {dimension_numbers = #tpu.dot_dimension_numbers<[1], [0], [0], [1], [0, 0, 1, 1], [], []>} : vector<16x8xbf16>, vector<8x32xbf16>, vector<16x32xf32> -> vector<16x32xf32>
    %120 = arith.addf %93, %119 : vector<16x32xf32>
    %121 = vector.broadcast %11 : vector<1x32xf32> to vector<16x32xf32>
    %122 = arith.addf %120, %121 : vector<16x32xf32>
    %123 = arith.addf %122, %0 : vector<16x32xf32>
    %c7 = arith.constant 7 : index
    %c0_45 = arith.constant 0 : index
    %124 = vector.load %arg12[%c7, %c0_45] : memref<16x96xf32, #tpu.memory_space<vmem>>, vector<1x32xf32>
    %c8 = arith.constant 8 : index
    %c0_46 = arith.constant 0 : index
    %125 = vector.load %arg12[%c8, %c0_46] : memref<16x96xf32, #tpu.memory_space<vmem>>, vector<1x32xf32>
    %cst_47 = arith.constant dense<0.000000e+00> : vector<16xf32>
    %126 = vector.multi_reduction <add>, %123, %cst_47 [1] : vector<16x32xf32> to vector<16xf32>
    %127 = vector.shape_cast %126 : vector<16xf32> to vector<16x1xf32>
    %cst_48 = arith.constant 3.200000e+01 : f32
    %128 = vector.broadcast %cst_48 : f32 to vector<16x1xf32>
    %129 = arith.divf %127, %128 : vector<16x1xf32>
    %130 = vector.broadcast %129 : vector<16x1xf32> to vector<16x32xf32>
    %131 = arith.subf %123, %130 : vector<16x32xf32>
    %132 = arith.mulf %131, %131 : vector<16x32xf32>
    %cst_49 = arith.constant dense<0.000000e+00> : vector<16xf32>
    %133 = vector.multi_reduction <add>, %132, %cst_49 [1] : vector<16x32xf32> to vector<16xf32>
    %134 = vector.shape_cast %133 : vector<16xf32> to vector<16x1xf32>
    %cst_50 = arith.constant 3.200000e+01 : f32
    %135 = vector.broadcast %cst_50 : f32 to vector<16x1xf32>
    %136 = arith.divf %134, %135 : vector<16x1xf32>
    %cst_51 = arith.constant 9.99999974E-6 : f32
    %137 = vector.broadcast %cst_51 : f32 to vector<16x1xf32>
    %138 = arith.addf %136, %137 : vector<16x1xf32>
    %139 = math.rsqrt %138 : vector<16x1xf32>
    %140 = vector.broadcast %139 : vector<16x1xf32> to vector<16x32xf32>
    %141 = arith.mulf %131, %140 : vector<16x32xf32>
    %142 = vector.broadcast %124 : vector<1x32xf32> to vector<16x32xf32>
    %143 = arith.mulf %141, %142 : vector<16x32xf32>
    %144 = vector.broadcast %125 : vector<1x32xf32> to vector<16x32xf32>
    %145 = arith.addf %143, %144 : vector<16x32xf32>
    %146 = arith.truncf %145 : vector<16x32xf32> to vector<16x32xbf16>
    %c0_52 = arith.constant 0 : index
    %c0_53 = arith.constant 0 : index
    %147 = vector.load %arg7[%c0_52, %c0_53] : memref<32x32xbf16, #tpu.memory_space<vmem>>, vector<32x32xbf16>
    %cst_54 = arith.constant dense<0.000000e+00> : vector<16x32xf32>
    %148 = tpu.matmul %146, %147, %cst_54 {dimension_numbers = #tpu.dot_dimension_numbers<[1], [0], [0], [1], [0, 0, 1, 1], [], []>} : vector<16x32xbf16>, vector<32x32xbf16>, vector<16x32xf32> -> vector<16x32xf32>
    %c4 = arith.constant 4 : index
    %c0_55 = arith.constant 0 : index
    %149 = vector.load %arg12[%c4, %c0_55] : memref<16x96xf32, #tpu.memory_space<vmem>>, vector<1x32xf32>
    %150 = vector.broadcast %149 : vector<1x32xf32> to vector<16x32xf32>
    %151 = arith.addf %148, %150 : vector<16x32xf32>
    %152 = arith.truncf %1 : vector<16x32xf32> to vector<16x32xbf16>
    %c0_56 = arith.constant 0 : index
    %c0_57 = arith.constant 0 : index
    %153 = vector.load %arg8[%c0_56, %c0_57] : memref<32x64xbf16, #tpu.memory_space<vmem>>, vector<32x64xbf16>
    %cst_58 = arith.constant dense<0.000000e+00> : vector<16x64xf32>
    %154 = tpu.matmul %152, %153, %cst_58 {dimension_numbers = #tpu.dot_dimension_numbers<[1], [0], [0], [1], [0, 0, 1, 1], [], []>} : vector<16x32xbf16>, vector<32x64xbf16>, vector<16x64xf32> -> vector<16x64xf32>
    %c1_59 = arith.constant 1 : index
    %c0_60 = arith.constant 0 : index
    %155 = vector.load %arg12[%c1_59, %c0_60] : memref<16x96xf32, #tpu.memory_space<vmem>>, vector<1x64xf32>
    %156 = vector.broadcast %155 : vector<1x64xf32> to vector<16x64xf32>
    %157 = arith.addf %154, %156 : vector<16x64xf32>
    %c0_61 = arith.constant 0 : index
    %c0_62 = arith.constant 0 : index
    %158 = vector.load %arg4[%c0_61, %c0_62] : memref<16x16xf32, #tpu.memory_space<vmem>>, vector<16x16xf32>
    %c5 = arith.constant 5 : index
    %c0_63 = arith.constant 0 : index
    %159 = vector.load %arg12[%c5, %c0_63] : memref<16x96xf32, #tpu.memory_space<vmem>>, vector<1x32xf32>
    %cst_64 = arith.constant 0.000000e+00 : f32
    %160 = vector.broadcast %cst_64 : f32 to vector<16x32xf32>
    %161 = vector.extract_strided_slice %151 {offsets = [0, 0], sizes = [16, 8], strides = [1, 1]} : vector<16x32xf32> to vector<16x8xf32>
    %162 = arith.truncf %161 : vector<16x8xf32> to vector<16x8xbf16>
    %163 = vector.extract_strided_slice %157 {offsets = [0, 0], sizes = [16, 8], strides = [1, 1]} : vector<16x64xf32> to vector<16x8xf32>
    %164 = arith.truncf %163 : vector<16x8xf32> to vector<16x8xbf16>
    %165 = vector.extract_strided_slice %157 {offsets = [0, 32], sizes = [16, 8], strides = [1, 1]} : vector<16x64xf32> to vector<16x8xf32>
    %166 = arith.truncf %165 : vector<16x8xf32> to vector<16x8xbf16>
    %cst_65 = arith.constant dense<0.000000e+00> : vector<16x16xf32>
    %167 = tpu.matmul %162, %164, %cst_65 {dimension_numbers = #tpu.dot_dimension_numbers<[1], [1], [0], [0], [0, 0, 1, 0], [], []>} : vector<16x8xbf16>, vector<16x8xbf16>, vector<16x16xf32> -> vector<16x16xf32>
    %cst_66 = arith.constant 0.353553385 : f32
    %168 = vector.broadcast %cst_66 : f32 to vector<16x16xf32>
    %169 = arith.mulf %167, %168 : vector<16x16xf32>
    %170 = arith.addf %169, %158 : vector<16x16xf32>
    %cst_67 = arith.constant dense<0xFF800000> : vector<16xf32>
    %171 = vector.multi_reduction <maximumf>, %170, %cst_67 [1] : vector<16x16xf32> to vector<16xf32>
    %172 = vector.shape_cast %171 : vector<16xf32> to vector<16x1xf32>
    %173 = vector.broadcast %172 : vector<16x1xf32> to vector<16x16xf32>
    %174 = arith.subf %170, %173 : vector<16x16xf32>
    %175 = math.exp %174 : vector<16x16xf32>
    %cst_68 = arith.constant dense<0.000000e+00> : vector<16xf32>
    %176 = vector.multi_reduction <add>, %175, %cst_68 [1] : vector<16x16xf32> to vector<16xf32>
    %177 = vector.shape_cast %176 : vector<16xf32> to vector<16x1xf32>
    %178 = tpu.reciprocal %177 {approx = true} : vector<16x1xf32> -> vector<16x1xf32>
    %179 = vector.broadcast %178 : vector<16x1xf32> to vector<16x16xf32>
    %180 = arith.mulf %175, %179 : vector<16x16xf32>
    %181 = arith.truncf %180 : vector<16x16xf32> to vector<16x16xbf16>
    %cst_69 = arith.constant dense<0.000000e+00> : vector<16x8xf32>
    %182 = tpu.matmul %181, %166, %cst_69 {dimension_numbers = #tpu.dot_dimension_numbers<[1], [0], [0], [1], [0, 0, 1, 1], [], []>} : vector<16x16xbf16>, vector<16x8xbf16>, vector<16x8xf32> -> vector<16x8xf32>
    %183 = arith.truncf %182 : vector<16x8xf32> to vector<16x8xbf16>
    %c0_70 = arith.constant 0 : index
    %c0_71 = arith.constant 0 : index
    %c0_72 = arith.constant 0 : index
    %184 = vector.load %arg9[%c0_70, %c0_71, %c0_72] : memref<4x8x32xbf16, #tpu.memory_space<vmem>>, vector<1x8x32xbf16>
    %185 = vector.shape_cast %184 : vector<1x8x32xbf16> to vector<8x32xbf16>
    %cst_73 = arith.constant dense<0.000000e+00> : vector<16x32xf32>
    %186 = tpu.matmul %183, %185, %cst_73 {dimension_numbers = #tpu.dot_dimension_numbers<[1], [0], [0], [1], [0, 0, 1, 1], [], []>} : vector<16x8xbf16>, vector<8x32xbf16>, vector<16x32xf32> -> vector<16x32xf32>
    %187 = arith.addf %160, %186 : vector<16x32xf32>
    %188 = vector.extract_strided_slice %151 {offsets = [0, 8], sizes = [16, 8], strides = [1, 1]} : vector<16x32xf32> to vector<16x8xf32>
    %189 = arith.truncf %188 : vector<16x8xf32> to vector<16x8xbf16>
    %190 = vector.extract_strided_slice %157 {offsets = [0, 8], sizes = [16, 8], strides = [1, 1]} : vector<16x64xf32> to vector<16x8xf32>
    %191 = arith.truncf %190 : vector<16x8xf32> to vector<16x8xbf16>
    %192 = vector.extract_strided_slice %157 {offsets = [0, 40], sizes = [16, 8], strides = [1, 1]} : vector<16x64xf32> to vector<16x8xf32>
    %193 = arith.truncf %192 : vector<16x8xf32> to vector<16x8xbf16>
    %cst_74 = arith.constant dense<0.000000e+00> : vector<16x16xf32>
    %194 = tpu.matmul %189, %191, %cst_74 {dimension_numbers = #tpu.dot_dimension_numbers<[1], [1], [0], [0], [0, 0, 1, 0], [], []>} : vector<16x8xbf16>, vector<16x8xbf16>, vector<16x16xf32> -> vector<16x16xf32>
    %cst_75 = arith.constant 0.353553385 : f32
    %195 = vector.broadcast %cst_75 : f32 to vector<16x16xf32>
    %196 = arith.mulf %194, %195 : vector<16x16xf32>
    %197 = arith.addf %196, %158 : vector<16x16xf32>
    %cst_76 = arith.constant dense<0xFF800000> : vector<16xf32>
    %198 = vector.multi_reduction <maximumf>, %197, %cst_76 [1] : vector<16x16xf32> to vector<16xf32>
    %199 = vector.shape_cast %198 : vector<16xf32> to vector<16x1xf32>
    %200 = vector.broadcast %199 : vector<16x1xf32> to vector<16x16xf32>
    %201 = arith.subf %197, %200 : vector<16x16xf32>
    %202 = math.exp %201 : vector<16x16xf32>
    %cst_77 = arith.constant dense<0.000000e+00> : vector<16xf32>
    %203 = vector.multi_reduction <add>, %202, %cst_77 [1] : vector<16x16xf32> to vector<16xf32>
    %204 = vector.shape_cast %203 : vector<16xf32> to vector<16x1xf32>
    %205 = tpu.reciprocal %204 {approx = true} : vector<16x1xf32> -> vector<16x1xf32>
    %206 = vector.broadcast %205 : vector<16x1xf32> to vector<16x16xf32>
    %207 = arith.mulf %202, %206 : vector<16x16xf32>
    %208 = arith.truncf %207 : vector<16x16xf32> to vector<16x16xbf16>
    %cst_78 = arith.constant dense<0.000000e+00> : vector<16x8xf32>
    %209 = tpu.matmul %208, %193, %cst_78 {dimension_numbers = #tpu.dot_dimension_numbers<[1], [0], [0], [1], [0, 0, 1, 1], [], []>} : vector<16x16xbf16>, vector<16x8xbf16>, vector<16x8xf32> -> vector<16x8xf32>
    %210 = arith.truncf %209 : vector<16x8xf32> to vector<16x8xbf16>
    %c1_79 = arith.constant 1 : index
    %c0_80 = arith.constant 0 : index
    %c0_81 = arith.constant 0 : index
    %211 = vector.load %arg9[%c1_79, %c0_80, %c0_81] : memref<4x8x32xbf16, #tpu.memory_space<vmem>>, vector<1x8x32xbf16>
    %212 = vector.shape_cast %211 : vector<1x8x32xbf16> to vector<8x32xbf16>
    %cst_82 = arith.constant dense<0.000000e+00> : vector<16x32xf32>
    %213 = tpu.matmul %210, %212, %cst_82 {dimension_numbers = #tpu.dot_dimension_numbers<[1], [0], [0], [1], [0, 0, 1, 1], [], []>} : vector<16x8xbf16>, vector<8x32xbf16>, vector<16x32xf32> -> vector<16x32xf32>
    %214 = arith.addf %187, %213 : vector<16x32xf32>
    %215 = vector.extract_strided_slice %151 {offsets = [0, 16], sizes = [16, 8], strides = [1, 1]} : vector<16x32xf32> to vector<16x8xf32>
    %216 = arith.truncf %215 : vector<16x8xf32> to vector<16x8xbf16>
    %217 = vector.extract_strided_slice %157 {offsets = [0, 16], sizes = [16, 8], strides = [1, 1]} : vector<16x64xf32> to vector<16x8xf32>
    %218 = arith.truncf %217 : vector<16x8xf32> to vector<16x8xbf16>
    %219 = vector.extract_strided_slice %157 {offsets = [0, 48], sizes = [16, 8], strides = [1, 1]} : vector<16x64xf32> to vector<16x8xf32>
    %220 = arith.truncf %219 : vector<16x8xf32> to vector<16x8xbf16>
    %cst_83 = arith.constant dense<0.000000e+00> : vector<16x16xf32>
    %221 = tpu.matmul %216, %218, %cst_83 {dimension_numbers = #tpu.dot_dimension_numbers<[1], [1], [0], [0], [0, 0, 1, 0], [], []>} : vector<16x8xbf16>, vector<16x8xbf16>, vector<16x16xf32> -> vector<16x16xf32>
    %cst_84 = arith.constant 0.353553385 : f32
    %222 = vector.broadcast %cst_84 : f32 to vector<16x16xf32>
    %223 = arith.mulf %221, %222 : vector<16x16xf32>
    %224 = arith.addf %223, %158 : vector<16x16xf32>
    %cst_85 = arith.constant dense<0xFF800000> : vector<16xf32>
    %225 = vector.multi_reduction <maximumf>, %224, %cst_85 [1] : vector<16x16xf32> to vector<16xf32>
    %226 = vector.shape_cast %225 : vector<16xf32> to vector<16x1xf32>
    %227 = vector.broadcast %226 : vector<16x1xf32> to vector<16x16xf32>
    %228 = arith.subf %224, %227 : vector<16x16xf32>
    %229 = math.exp %228 : vector<16x16xf32>
    %cst_86 = arith.constant dense<0.000000e+00> : vector<16xf32>
    %230 = vector.multi_reduction <add>, %229, %cst_86 [1] : vector<16x16xf32> to vector<16xf32>
    %231 = vector.shape_cast %230 : vector<16xf32> to vector<16x1xf32>
    %232 = tpu.reciprocal %231 {approx = true} : vector<16x1xf32> -> vector<16x1xf32>
    %233 = vector.broadcast %232 : vector<16x1xf32> to vector<16x16xf32>
    %234 = arith.mulf %229, %233 : vector<16x16xf32>
    %235 = arith.truncf %234 : vector<16x16xf32> to vector<16x16xbf16>
    %cst_87 = arith.constant dense<0.000000e+00> : vector<16x8xf32>
    %236 = tpu.matmul %235, %220, %cst_87 {dimension_numbers = #tpu.dot_dimension_numbers<[1], [0], [0], [1], [0, 0, 1, 1], [], []>} : vector<16x16xbf16>, vector<16x8xbf16>, vector<16x8xf32> -> vector<16x8xf32>
    %237 = arith.truncf %236 : vector<16x8xf32> to vector<16x8xbf16>
    %c2_88 = arith.constant 2 : index
    %c0_89 = arith.constant 0 : index
    %c0_90 = arith.constant 0 : index
    %238 = vector.load %arg9[%c2_88, %c0_89, %c0_90] : memref<4x8x32xbf16, #tpu.memory_space<vmem>>, vector<1x8x32xbf16>
    %239 = vector.shape_cast %238 : vector<1x8x32xbf16> to vector<8x32xbf16>
    %cst_91 = arith.constant dense<0.000000e+00> : vector<16x32xf32>
    %240 = tpu.matmul %237, %239, %cst_91 {dimension_numbers = #tpu.dot_dimension_numbers<[1], [0], [0], [1], [0, 0, 1, 1], [], []>} : vector<16x8xbf16>, vector<8x32xbf16>, vector<16x32xf32> -> vector<16x32xf32>
    %241 = arith.addf %214, %240 : vector<16x32xf32>
    %242 = vector.extract_strided_slice %151 {offsets = [0, 24], sizes = [16, 8], strides = [1, 1]} : vector<16x32xf32> to vector<16x8xf32>
    %243 = arith.truncf %242 : vector<16x8xf32> to vector<16x8xbf16>
    %244 = vector.extract_strided_slice %157 {offsets = [0, 24], sizes = [16, 8], strides = [1, 1]} : vector<16x64xf32> to vector<16x8xf32>
    %245 = arith.truncf %244 : vector<16x8xf32> to vector<16x8xbf16>
    %246 = vector.extract_strided_slice %157 {offsets = [0, 56], sizes = [16, 8], strides = [1, 1]} : vector<16x64xf32> to vector<16x8xf32>
    %247 = arith.truncf %246 : vector<16x8xf32> to vector<16x8xbf16>
    %cst_92 = arith.constant dense<0.000000e+00> : vector<16x16xf32>
    %248 = tpu.matmul %243, %245, %cst_92 {dimension_numbers = #tpu.dot_dimension_numbers<[1], [1], [0], [0], [0, 0, 1, 0], [], []>} : vector<16x8xbf16>, vector<16x8xbf16>, vector<16x16xf32> -> vector<16x16xf32>
    %cst_93 = arith.constant 0.353553385 : f32
    %249 = vector.broadcast %cst_93 : f32 to vector<16x16xf32>
    %250 = arith.mulf %248, %249 : vector<16x16xf32>
    %251 = arith.addf %250, %158 : vector<16x16xf32>
    %cst_94 = arith.constant dense<0xFF800000> : vector<16xf32>
    %252 = vector.multi_reduction <maximumf>, %251, %cst_94 [1] : vector<16x16xf32> to vector<16xf32>
    %253 = vector.shape_cast %252 : vector<16xf32> to vector<16x1xf32>
    %254 = vector.broadcast %253 : vector<16x1xf32> to vector<16x16xf32>
    %255 = arith.subf %251, %254 : vector<16x16xf32>
    %256 = math.exp %255 : vector<16x16xf32>
    %cst_95 = arith.constant dense<0.000000e+00> : vector<16xf32>
    %257 = vector.multi_reduction <add>, %256, %cst_95 [1] : vector<16x16xf32> to vector<16xf32>
    %258 = vector.shape_cast %257 : vector<16xf32> to vector<16x1xf32>
    %259 = tpu.reciprocal %258 {approx = true} : vector<16x1xf32> -> vector<16x1xf32>
    %260 = vector.broadcast %259 : vector<16x1xf32> to vector<16x16xf32>
    %261 = arith.mulf %256, %260 : vector<16x16xf32>
    %262 = arith.truncf %261 : vector<16x16xf32> to vector<16x16xbf16>
    %cst_96 = arith.constant dense<0.000000e+00> : vector<16x8xf32>
    %263 = tpu.matmul %262, %247, %cst_96 {dimension_numbers = #tpu.dot_dimension_numbers<[1], [0], [0], [1], [0, 0, 1, 1], [], []>} : vector<16x16xbf16>, vector<16x8xbf16>, vector<16x8xf32> -> vector<16x8xf32>
    %264 = arith.truncf %263 : vector<16x8xf32> to vector<16x8xbf16>
    %c3_97 = arith.constant 3 : index
    %c0_98 = arith.constant 0 : index
    %c0_99 = arith.constant 0 : index
    %265 = vector.load %arg9[%c3_97, %c0_98, %c0_99] : memref<4x8x32xbf16, #tpu.memory_space<vmem>>, vector<1x8x32xbf16>
    %266 = vector.shape_cast %265 : vector<1x8x32xbf16> to vector<8x32xbf16>
    %cst_100 = arith.constant dense<0.000000e+00> : vector<16x32xf32>
    %267 = tpu.matmul %264, %266, %cst_100 {dimension_numbers = #tpu.dot_dimension_numbers<[1], [0], [0], [1], [0, 0, 1, 1], [], []>} : vector<16x8xbf16>, vector<8x32xbf16>, vector<16x32xf32> -> vector<16x32xf32>
    %268 = arith.addf %241, %267 : vector<16x32xf32>
    %269 = vector.broadcast %159 : vector<1x32xf32> to vector<16x32xf32>
    %270 = arith.addf %268, %269 : vector<16x32xf32>
    %271 = arith.addf %270, %145 : vector<16x32xf32>
    %c9 = arith.constant 9 : index
    %c0_101 = arith.constant 0 : index
    %272 = vector.load %arg12[%c9, %c0_101] : memref<16x96xf32, #tpu.memory_space<vmem>>, vector<1x32xf32>
    %c10 = arith.constant 10 : index
    %c0_102 = arith.constant 0 : index
    %273 = vector.load %arg12[%c10, %c0_102] : memref<16x96xf32, #tpu.memory_space<vmem>>, vector<1x32xf32>
    %cst_103 = arith.constant dense<0.000000e+00> : vector<16xf32>
    %274 = vector.multi_reduction <add>, %271, %cst_103 [1] : vector<16x32xf32> to vector<16xf32>
    %275 = vector.shape_cast %274 : vector<16xf32> to vector<16x1xf32>
    %cst_104 = arith.constant 3.200000e+01 : f32
    %276 = vector.broadcast %cst_104 : f32 to vector<16x1xf32>
    %277 = arith.divf %275, %276 : vector<16x1xf32>
    %278 = vector.broadcast %277 : vector<16x1xf32> to vector<16x32xf32>
    %279 = arith.subf %271, %278 : vector<16x32xf32>
    %280 = arith.mulf %279, %279 : vector<16x32xf32>
    %cst_105 = arith.constant dense<0.000000e+00> : vector<16xf32>
    %281 = vector.multi_reduction <add>, %280, %cst_105 [1] : vector<16x32xf32> to vector<16xf32>
    %282 = vector.shape_cast %281 : vector<16xf32> to vector<16x1xf32>
    %cst_106 = arith.constant 3.200000e+01 : f32
    %283 = vector.broadcast %cst_106 : f32 to vector<16x1xf32>
    %284 = arith.divf %282, %283 : vector<16x1xf32>
    %cst_107 = arith.constant 9.99999974E-6 : f32
    %285 = vector.broadcast %cst_107 : f32 to vector<16x1xf32>
    %286 = arith.addf %284, %285 : vector<16x1xf32>
    %287 = math.rsqrt %286 : vector<16x1xf32>
    %288 = vector.broadcast %287 : vector<16x1xf32> to vector<16x32xf32>
    %289 = arith.mulf %279, %288 : vector<16x32xf32>
    %290 = vector.broadcast %272 : vector<1x32xf32> to vector<16x32xf32>
    %291 = arith.mulf %289, %290 : vector<16x32xf32>
    %292 = vector.broadcast %273 : vector<1x32xf32> to vector<16x32xf32>
    %293 = arith.addf %291, %292 : vector<16x32xf32>
    %294 = arith.truncf %293 : vector<16x32xf32> to vector<16x32xbf16>
    %c0_108 = arith.constant 0 : index
    %c0_109 = arith.constant 0 : index
    %295 = vector.load %arg10[%c0_108, %c0_109] : memref<32x64xbf16, #tpu.memory_space<vmem>>, vector<32x64xbf16>
    %cst_110 = arith.constant dense<0.000000e+00> : vector<16x64xf32>
    %296 = tpu.matmul %294, %295, %cst_110 {dimension_numbers = #tpu.dot_dimension_numbers<[1], [0], [0], [1], [0, 0, 1, 1], [], []>} : vector<16x32xbf16>, vector<32x64xbf16>, vector<16x64xf32> -> vector<16x64xf32>
    %c2_111 = arith.constant 2 : index
    %c0_112 = arith.constant 0 : index
    %297 = vector.load %arg12[%c2_111, %c0_112] : memref<16x96xf32, #tpu.memory_space<vmem>>, vector<1x64xf32>
    %298 = vector.broadcast %297 : vector<1x64xf32> to vector<16x64xf32>
    %299 = arith.addf %296, %298 : vector<16x64xf32>
    %cst_113 = arith.constant 0.000000e+00 : f32
    %300 = vector.broadcast %cst_113 : f32 to vector<16x64xf32>
    %301 = arith.maximumf %299, %300 : vector<16x64xf32>
    %302 = arith.truncf %301 : vector<16x64xf32> to vector<16x64xbf16>
    %c0_114 = arith.constant 0 : index
    %c0_115 = arith.constant 0 : index
    %303 = vector.load %arg11[%c0_114, %c0_115] : memref<64x32xbf16, #tpu.memory_space<vmem>>, vector<64x32xbf16>
    %cst_116 = arith.constant dense<0.000000e+00> : vector<16x32xf32>
    %304 = tpu.matmul %302, %303, %cst_116 {dimension_numbers = #tpu.dot_dimension_numbers<[1], [0], [0], [1], [0, 0, 1, 1], [], []>} : vector<16x64xbf16>, vector<64x32xbf16>, vector<16x32xf32> -> vector<16x32xf32>
    %c6 = arith.constant 6 : index
    %c0_117 = arith.constant 0 : index
    %305 = vector.load %arg12[%c6, %c0_117] : memref<16x96xf32, #tpu.memory_space<vmem>>, vector<1x32xf32>
    %306 = vector.broadcast %305 : vector<1x32xf32> to vector<16x32xf32>
    %307 = arith.addf %304, %306 : vector<16x32xf32>
    %308 = arith.addf %307, %293 : vector<16x32xf32>
    %c11 = arith.constant 11 : index
    %c0_118 = arith.constant 0 : index
    %309 = vector.load %arg12[%c11, %c0_118] : memref<16x96xf32, #tpu.memory_space<vmem>>, vector<1x32xf32>
    %c12 = arith.constant 12 : index
    %c0_119 = arith.constant 0 : index
    %310 = vector.load %arg12[%c12, %c0_119] : memref<16x96xf32, #tpu.memory_space<vmem>>, vector<1x32xf32>
    %cst_120 = arith.constant dense<0.000000e+00> : vector<16xf32>
    %311 = vector.multi_reduction <add>, %308, %cst_120 [1] : vector<16x32xf32> to vector<16xf32>
    %312 = vector.shape_cast %311 : vector<16xf32> to vector<16x1xf32>
    %cst_121 = arith.constant 3.200000e+01 : f32
    %313 = vector.broadcast %cst_121 : f32 to vector<16x1xf32>
    %314 = arith.divf %312, %313 : vector<16x1xf32>
    %315 = vector.broadcast %314 : vector<16x1xf32> to vector<16x32xf32>
    %316 = arith.subf %308, %315 : vector<16x32xf32>
    %317 = arith.mulf %316, %316 : vector<16x32xf32>
    %cst_122 = arith.constant dense<0.000000e+00> : vector<16xf32>
    %318 = vector.multi_reduction <add>, %317, %cst_122 [1] : vector<16x32xf32> to vector<16xf32>
    %319 = vector.shape_cast %318 : vector<16xf32> to vector<16x1xf32>
    %cst_123 = arith.constant 3.200000e+01 : f32
    %320 = vector.broadcast %cst_123 : f32 to vector<16x1xf32>
    %321 = arith.divf %319, %320 : vector<16x1xf32>
    %cst_124 = arith.constant 9.99999974E-6 : f32
    %322 = vector.broadcast %cst_124 : f32 to vector<16x1xf32>
    %323 = arith.addf %321, %322 : vector<16x1xf32>
    %324 = math.rsqrt %323 : vector<16x1xf32>
    %325 = vector.broadcast %324 : vector<16x1xf32> to vector<16x32xf32>
    %326 = arith.mulf %316, %325 : vector<16x32xf32>
    %327 = vector.broadcast %309 : vector<1x32xf32> to vector<16x32xf32>
    %328 = arith.mulf %326, %327 : vector<16x32xf32>
    %329 = vector.broadcast %310 : vector<1x32xf32> to vector<16x32xf32>
    %330 = arith.addf %328, %329 : vector<16x32xf32>
    %c0_125 = arith.constant 0 : index
    %c0_126 = arith.constant 0 : index
    %331 = vector.load %arg13[%c0_125, %c0_126] : memref<16x32xf32, #tpu.memory_space<vmem>>, vector<16x32xf32>
    tpu.vector_store %arg13[%c0_125, %c0_126], %330 {strides = array<i32>} : memref<16x32xf32, #tpu.memory_space<vmem>>, vector<16x32xf32>,
    return
  }
  func.func @transform_0(%arg0: i32) -> (i32, i32) {
    %c0_i32 = arith.constant 0 : i32
    %c0_i32_0 = arith.constant 0 : i32
    %c0_i32_1 = arith.constant 0 : i32
    return %c0_i32, %c0_i32_0 : i32, i32
  }
  func.func @transform_1(%arg0: i32) -> (i32, i32) {
    %c0_i32 = arith.constant 0 : i32
    %c0_i32_0 = arith.constant 0 : i32
    %c0_i32_1 = arith.constant 0 : i32
    return %c0_i32, %c0_i32_0 : i32, i32
  }
  func.func @transform_2(%arg0: i32) -> (i32, i32) {
    %c0_i32 = arith.constant 0 : i32
    %c0_i32_0 = arith.constant 0 : i32
    %c0_i32_1 = arith.constant 0 : i32
    return %c0_i32, %c0_i32_0 : i32, i32
  }
  func.func @transform_3(%arg0: i32) -> (i32, i32) {
    %c0_i32 = arith.constant 0 : i32
    %c0_i32_0 = arith.constant 0 : i32
    %c0_i32_1 = arith.constant 0 : i32
    return %c0_i32, %c0_i32_0 : i32, i32
  }
  func.func @transform_4(%arg0: i32) -> (i32, i32) {
    %c0_i32 = arith.constant 0 : i32
    %c0_i32_0 = arith.constant 0 : i32
    %c0_i32_1 = arith.constant 0 : i32
    return %c0_i32, %c0_i32_0 : i32, i32
  }
  func.func @transform_5(%arg0: i32) -> (i32, i32, i32) {
    %c0_i32 = arith.constant 0 : i32
    %c0_i32_0 = arith.constant 0 : i32
    %c0_i32_1 = arith.constant 0 : i32
    %c0_i32_2 = arith.constant 0 : i32
    return %c0_i32, %c0_i32_0, %c0_i32_1 : i32, i32, i32
  }
  func.func @transform_6(%arg0: i32) -> (i32, i32) {
    %c0_i32 = arith.constant 0 : i32
    %c0_i32_0 = arith.constant 0 : i32
    %c0_i32_1 = arith.constant 0 : i32
    return %c0_i32, %c0_i32_0 : i32, i32
  }
  func.func @transform_7(%arg0: i32) -> (i32, i32) {
    %c0_i32 = arith.constant 0 : i32
    %c0_i32_0 = arith.constant 0 : i32
    %c0_i32_1 = arith.constant 0 : i32
    return %c0_i32, %c0_i32_0 : i32, i32
  }
  func.func @transform_8(%arg0: i32) -> (i32, i32, i32) {
    %c0_i32 = arith.constant 0 : i32
    %c0_i32_0 = arith.constant 0 : i32
    %c0_i32_1 = arith.constant 0 : i32
    %c0_i32_2 = arith.constant 0 : i32
    return %c0_i32, %c0_i32_0, %c0_i32_1 : i32, i32, i32
  }
  func.func @transform_9(%arg0: i32) -> (i32, i32) {
    %c0_i32 = arith.constant 0 : i32
    %c0_i32_0 = arith.constant 0 : i32
    %c0_i32_1 = arith.constant 0 : i32
    return %c0_i32, %c0_i32_0 : i32, i32
  }
  func.func @transform_10(%arg0: i32) -> (i32, i32) {
    %c0_i32 = arith.constant 0 : i32
    %c0_i32_0 = arith.constant 0 : i32
    %c0_i32_1 = arith.constant 0 : i32
    return %c0_i32, %c0_i32_0 : i32, i32
  }
  func.func @transform_11(%arg0: i32) -> (i32, i32) {
    %c0_i32 = arith.constant 0 : i32
    %c0_i32_0 = arith.constant 0 : i32
    %c0_i32_1 = arith.constant 0 : i32
    return %c0_i32, %c0_i32_0 : i32, i32
  }
  func.func @transform_12(%arg0: i32) -> (i32, i32) {
    %c0_i32 = arith.constant 0 : i32
    %c0_i32_0 = arith.constant 0 : i32
    %c0_i32_1 = arith.constant 0 : i32
    return %c0_i32, %c0_i32_0 : i32, i32
  }
}

</mosaic_0001>

<bundles_post_ra>
// kernel: tpu_custom_call.1
= control target key start
LH: loop header
LB: loop body
LE: loop exit
PB: predicated region body
PF: predicated region fallthrough
CT: control target
= control target key end

     0   :  { %17 = vsyncpa [#allocation3], 0  ;;  %s3165_s0 = inlined_call_operand.vmem [shape: f32[16,32], index: 0, kind: input, shape index: {}]   ;;  %s3166_s1 = inlined_call_operand.vmem [shape: f32[16,32], index: 1, kind: input, shape index: {}]   ;;  %s3167_s2 = inlined_call_operand.vmem [shape: f32[16,16], index: 2, kind: input, shape index: {}]   ;;  %s3168_s3 = inlined_call_operand.hbm [shape: f32[16,16], index: 3, kind: input, shape index: {}]   ;;  %s3169_s4 = inlined_call_operand.hbm [shape: bf16[32,96], index: 4, kind: input, shape index: {}]   ;;  %s3170_s5 = inlined_call_operand.vmem [shape: bf16[4,8,32], index: 5, kind: input, shape index: {}]   ;;  %s3171_s6 = inlined_call_operand.hbm [shape: bf16[32,32], index: 6, kind: input, shape index: {}]   ;;  %s3172_s7 = inlined_call_operand.hbm [shape: bf16[32,64], index: 7, kind: input, shape index: {}]   ;;  %s3173_s8 = inlined_call_operand.hbm [shape: bf16[4,8,32], index: 8, kind: input, shape index: {}]   ;;  %s3174_s9 = inlined_call_operand.vmem [shape: bf16[32,64], index: 9, kind: input, shape index: {}]   ;;  %s3175_s10 = inlined_call_operand.vmem [shape: bf16[64,32], index: 10, kind: input, shape index: {}]   ;;  %s3176_s11 = inlined_call_operand.hbm [shape: f32[16,96], index: 11, kind: input, shape index: {}]   ;;  %s3177_s12 = inlined_call_operand.hbm [shape: f32[16,32], index: 12, kind: output, shape index: {}]  }
   0x1   :  { %18 = vsyncpa [#allocation6], 0 }
   0x2   :  { %19 = vsyncpa [#allocation9], 0 }
   0x3   :  { %20 = vsyncpa [#allocation12], 0 }
   0x4   :  { %21 = vsyncpa [#allocation4], 0  ;;  %s2640_s21 = smov [#allocation5]   ;;  %s2476_s25 = scalar_lea.hbm %s3169_s4, 256 }
   0x5   :  { %s45_s22 = sshll.u32 %s2640_s21, 4  ;;  %p2477_p0 = scmp.ne.s32.totalorder %s3169_s4, %s2476_s25  ;;  %s46_s22 = int_to_ptr.vmem [resolvable:$true] %s45_s22 }
   0x6   :  { %p2480_p1 = scmp.lt.u32.totalorder %s2476_s25, %s3169_s4 }
   0x8   :  { %p2482_p2 = pnand %p2480_p1, %p2477_p0 }
   0xa   :  { %2485 = shalt.err (!%p2482_p2)
}
   0xb   :  { %s2486_s30 = scalar_lea.vmem %s46_s22, 256  ;;  %p2491_p4 = scmp.lt.s32.totalorder %s46_s22, %s46_s22 }
   0xc   :  { %p2487_p3 = scmp.ne.s32.totalorder %s46_s22, %s2486_s30  ;;  %p2492_p5 = scmp.lt.s32.totalorder %s2486_s30, %s2486_s30 }
   0xe   :  { %p2493_p6 = por %p2492_p5, %p2491_p4 }
  0x10   :  { %p2494_p7 = pnand %p2493_p6, %p2487_p3 }
  0x12   :  { %2497 = shalt.err (!%p2494_p7)
}
  0x13   :  { %s2641_s13 = smov 64   ;;  %s2642_s14 = smov 4  }
  0x14   :  { %51 = dma.hbm_to_vmem [thread:$0]  %s3169_s4, 256, %s46_s22, [#allocation6], %s2641_s13, %s2641_s13, %s2642_s14  }
  0x15   :  { %s2643_s17 = smov [#allocation8]   ;;  %s2644_s19 = smov [#allocation2]  }
  0x16   :  { %s71_s18 = sshll.u32 %s2643_s17, 4  ;;  %s33_s20 = sshll.u32 %s2644_s19, 4  ;;  %s72_s18 = int_to_ptr.vmem [resolvable:$true] %s71_s18  ;;  %s34_s20 = int_to_ptr.vmem [resolvable:$true] %s33_s20 }
  0x17   :  { %s2498_s24 = scalar_lea.hbm %s3172_s7, 256 }
  0x18   :  { %p2499_p8 = scmp.ne.s32.totalorder %s3172_s7, %s2498_s24  ;;  %p2502_p9 = scmp.lt.u32.totalorder %s2498_s24, %s3172_s7 }
  0x1a   :  { %p2504_p10 = pnand %p2502_p9, %p2499_p8 }
  0x1c   :  { %2507 = shalt.err (!%p2504_p10)
}
  0x1d   :  { %s2508_s4 = scalar_lea.vmem %s72_s18, 256  ;;  %p2513_p12 = scmp.lt.s32.totalorder %s72_s18, %s72_s18 }
  0x1e   :  { %p2509_p11 = scmp.ne.s32.totalorder %s72_s18, %s2508_s4  ;;  %p2514_p13 = scmp.lt.s32.totalorder %s2508_s4, %s2508_s4 }
  0x20   :  { %p2515_p0 = por %p2514_p13, %p2513_p12 }
  0x22   :  { %p2516_p1 = pnand %p2515_p0, %p2509_p11 }
  0x24   :  { %2519 = shalt.err (!%p2516_p1)
}
  0x25   :  { %77 = dma.hbm_to_vmem [thread:$0]  %s3172_s7, 256, %s72_s18, [#allocation9], %s2641_s13, %s2641_s13, %s2642_s14  }
  0x26   :  { %s2520_s16 = scalar_lea.hbm %s3168_s3, 256 }
  0x27   :  { %p2521_p2 = scmp.ne.s32.totalorder %s3168_s3, %s2520_s16  ;;  %p2524_p3 = scmp.lt.u32.totalorder %s2520_s16, %s3168_s3 }
  0x29   :  { %p2526_p4 = pnand %p2524_p3, %p2521_p2 }
  0x2b   :  { %2529 = shalt.err (!%p2526_p4)
}
  0x2c   :  { %s2530_s24 = scalar_lea.vmem %s34_s20, 256  ;;  %p2535_p6 = scmp.lt.s32.totalorder %s34_s20, %s34_s20 }
  0x2d   :  { %p2531_p5 = scmp.ne.s32.totalorder %s34_s20, %s2530_s24  ;;  %p2536_p7 = scmp.lt.s32.totalorder %s2530_s24, %s2530_s24 }
  0x2f   :  { %p2537_p8 = por %p2536_p7, %p2535_p6 }
  0x31   :  { %p2538_p9 = pnand %p2537_p8, %p2531_p5 }
  0x33   :  { %2541 = shalt.err (!%p2538_p9)
}
  0x34   :  { %s2645_s7 = smov 128   ;;  %s2646_s18 = smov 8  }
  0x35   :  { %39 = dma.hbm_to_vmem [thread:$0]  %s3168_s3, 256, %s34_s20, [#allocation3], %s2645_s7, %s2645_s7, %s2646_s18  }
  0x36   :  { %s2647_s27 = smov [#allocation7]   ;;  %s2648_s4 = smov [#allocation10]  }
  0x37   :  { %s59_s28 = sshll.u32 %s2647_s27, 4  ;;  %s83_s22 = sshll.u32 %s2648_s4, 4  ;;  %s60_s28 = int_to_ptr.vmem [resolvable:$true] %s59_s28  ;;  %s84_s22 = int_to_ptr.vmem [resolvable:$true] %s83_s22 }
  0x38   :  { %s2542_s15 = scalar_lea.hbm %s3171_s6, 256 }
  0x39   :  { %p2543_p10 = scmp.ne.s32.totalorder %s3171_s6, %s2542_s15  ;;  %p2546_p11 = scmp.lt.u32.totalorder %s2542_s15, %s3171_s6 }
  0x3b   :  { %p2548_p12 = pnand %p2546_p11, %p2543_p10 }
  0x3d   :  { %2551 = shalt.err (!%p2548_p12)
}
  0x3e   :  { %s2552_s3 = scalar_lea.vmem %s60_s28, 256  ;;  %p2557_p0 = scmp.lt.s32.totalorder %s60_s28, %s60_s28 }
  0x3f   :  { %p2553_p13 = scmp.ne.s32.totalorder %s60_s28, %s2552_s3  ;;  %p2558_p1 = scmp.lt.s32.totalorder %s2552_s3, %s2552_s3 }
  0x41   :  { %p2559_p2 = por %p2558_p1, %p2557_p0 }
  0x43   :  { %p2560_p3 = pnand %p2559_p2, %p2553_p13 }
  0x45   :  { %2563 = shalt.err (!%p2560_p3)
}
  0x46   :  { %65 = dma.hbm_to_vmem [thread:$0]  %s3171_s6, 256, %s60_s28, [#allocation6], %s2641_s13, %s2641_s13, %s2642_s14  }
  0x47   :  { %s2564_s26 = scalar_lea.hbm %s3173_s8, 256 }
  0x48   :  { %p2565_p4 = scmp.ne.s32.totalorder %s3173_s8, %s2564_s26  ;;  %p2568_p5 = scmp.lt.u32.totalorder %s2564_s26, %s3173_s8 }
  0x4a   :  { %p2570_p6 = pnand %p2568_p5, %p2565_p4 }
  0x4c   :  { %2573 = shalt.err (!%p2570_p6)
}
  0x4d   :  { %s2574_s15 = scalar_lea.vmem %s84_s22, 256  ;;  %p2579_p8 = scmp.lt.s32.totalorder %s84_s22, %s84_s22 }
  0x4e   :  { %p2575_p7 = scmp.ne.s32.totalorder %s84_s22, %s2574_s15  ;;  %p2580_p9 = scmp.lt.s32.totalorder %s2574_s15, %s2574_s15 }
  0x50   :  { %p2581_p10 = por %p2580_p9, %p2579_p8 }
  0x52   :  { %p2582_p11 = pnand %p2581_p10, %p2575_p7 }
  0x54   :  { %2585 = shalt.err (!%p2582_p11)
}
  0x55   :  { %89 = dma.hbm_to_vmem [thread:$0]  %s3173_s8, 256, %s84_s22, [#allocation9], %s2641_s13, %s2641_s13, %s2642_s14  }
  0x56   :  { %s2649_s16 = smov [#allocation11]   ;;  %s2586_s3 = scalar_lea.hbm %s3176_s11, 256 }
  0x57   :  { %s99_s17 = sshll.u32 %s2649_s16, 4  ;;  %p2587_p12 = scmp.ne.s32.totalorder %s3176_s11, %s2586_s3  ;;  %s100_s17 = int_to_ptr.vmem [resolvable:$true] %s99_s17 }
  0x58   :  { %p2590_p13 = scmp.lt.u32.totalorder %s2586_s3, %s3176_s11 }
  0x5a   :  { %p2592_p0 = pnand %p2590_p13, %p2587_p12 }
  0x5c   :  { %2595 = shalt.err (!%p2592_p0)
}
  0x5d   :  { %s2596_s26 = scalar_lea.vmem %s100_s17, 256  ;;  %p2601_p2 = scmp.lt.s32.totalorder %s100_s17, %s100_s17 }
  0x5e   :  { %p2597_p1 = scmp.ne.s32.totalorder %s100_s17, %s2596_s26  ;;  %p2602_p3 = scmp.lt.s32.totalorder %s2596_s26, %s2596_s26 }
  0x60   :  { %p2603_p4 = por %p2602_p3, %p2601_p2 }
  0x62   :  { %p2604_p5 = pnand %p2603_p4, %p2597_p1 }
  0x64   :  { %2607 = shalt.err (!%p2604_p5)
}
  0x65   :  { %105 = dma.hbm_to_vmem [thread:$0]  %s3176_s11, 256, %s100_s17, [#allocation12], %s2645_s7, %s2645_s7, %s2646_s18  }
  0x66   :  { %2630 = dma.done.wait [#allocation3], 256  }
  0x67   :  { %2631 = vsyncadd [#allocation3], 4294967040 }
  0x68   :  { %2632 = dma.done.wait [#allocation6], 512  }
  0x69   :  { %2633 = vsyncadd [#allocation6], 4294966784 }
  0x6a   :  { %2634 = dma.done.wait [#allocation9], 512  }
  0x6b   :  { %2635 = vsyncadd [#allocation9], 4294966784 }
  0x6c   :  { %2636 = dma.done.wait [#allocation12], 256  }
  0x6d   :  { %2637 = vsyncadd [#allocation12], 4294967040  ;;  %v2650_v0 = vmov 0.0   ;;  %vm2651_vm0 = vmmov 0   ;;  %v2388_v1 = vld [vmem:[#allocation5] sm:$0xff]   ;;  %v2389_v2 = vld [vmem:[#allocation5 + $0x8] sm:$0xff]  }
  0x6e   :  { %2177 = vmatprep.subr.bf16.mxu1 %v2650_v0  ;;  %2181 = vmatprep.mubr.msk.bf16.mxu1 %vm2651_vm0, %v2650_v0  ;;  %v2827_v3 = vld [vmem:[%s3165_s0] sm:$0xff]  ;;  %v2832_v4 = vld [vmem:[%s3165_s0 + $0x8] sm:$0xff]  ;;  %vm151_vm1 = vcmask 261120   ;;  %v2055_v6 = vld [vmem:[#allocation11] ss:$0 sm:$0xff]  ;;  %s2652_s0 = smov 120  }
  0x6f   :  { %2191 = vmatprep.subr.bf16.mxu0 %v2650_v0  ;;  %2193 = vmatprep.mubr.msk.bf16.mxu0 %vm2651_vm0, %v2650_v0  ;;  %v129_v5 = vpack.c.bf16 %v2832_v4, %v2827_v3  ;;  %s2653_s29 = smov 96   ;;  %s2654_s30 = smov 88   ;;  %vm203_vm2 = vcmask 64512   ;;  %v2863_v20 = vld [vmem:[%s3167_s2] sm:$0xff]  ;;  %vm255_vm3 = vcmask 130048   ;;  %v2868_v24 = vld [vmem:[%s3167_s2 + $0x8] sm:$0xff] }
  0x70   :  { %2178 = vmatpush3.bf16.msra.mxu1 %v2388_v1  ;;  %s2655_s2 = smov 56   ;;  %s2656_s17 = smov 80   ;;  %vm459_vm4 = vcmask 1043456   ;;  %vm1946_vm5 = vcmask 523264  }
  0x71   :  { %2179 = vmatprep.subr.bf16.mxu1 %v2650_v0  ;;  %s2657_s19 = smov 112   ;;  %s2658_s23 = smov 72  }
  0x72   :  { %s2659_s24 = smov 48   ;;  %s2660_s25 = smov 104  }
  0x73   :  { %s2661_s14 = smov 40  }
  0x74   :  { %2180 = vmatpush3.bf16.msra.mxu1 %v2389_v2 }
  0x75   :  { %2185 = vmatprep.subr.bf16.mxu1 %v2650_v0 }
  0x77   :  { %2182 = vmatmul.mubr.msk.bf16.vlgmr.msra.gmra.mrb[0].mxu1 %vm151_vm1, %v129_v5 }
  0x78   :  { %2187 = vmatprep.mubr.msk.bf16.mxu1 %vm2651_vm0, %v2650_v0 }
 0x14a   :  { %v189_v7 = vpop.f32.mrb[0].mxu1 }
 0x14b   :  { %v2183_v8 = vpop.f32.mrb[1].mxu1  ;;  %v190_v10 = vadd.f32 %v2055_v6, %v189_v7 }
 0x14c   :  { %v192_v9 = vpop.f32.mrb[2].mxu1 }
 0x14d   :  { %v193_v11 = vadd.f32 %v2055_v6, %v192_v9  ;;  %v2184_v12 = vpop.f32.mrb[3].mxu1 }
 0x14f   :  { %v2841_v13 = vpack.c.bf16 %v193_v11, %v190_v10 }
 0x151   :  { %328 = vrot.lane.b32.xlu1 %v2841_v13, %s2652_s0  ;;  %201 = vrot.lane.b32.xlu0 %v2841_v13, %s2653_s29 }
 0x155   :  { %330 = vrot.lane.b32.xlu0 %v2841_v13, %s2654_s30 }
 0x1c3   :  { %v202_v14 = vpop.permute.xlu0 %201  ;;  %v329_v18 = vpop.permute.xlu1 %328 }
 0x1c4   :  { %v208_v15 = vsel %vm203_vm2, %v202_v14, 0 }
 0x1c5   :  { %2186 = vmatpush3.bf16.xpose.msra.mxu1 %v208_v15 }
 0x1c6   :  { %2197 = vmatprep.subr.bf16.mxu1 %v2650_v0 }
 0x1c7   :  { %v331_v16 = vpop.permute.xlu0 %330 }
 0x1c8   :  { %v336_v17 = vsel %vm203_vm2, %v331_v16, 0 }
 0x1cc   :  { %2188 = vmatmul.mubr.msk.bf16.vlgmr.msra.gmra.mrb[4].mxu1 %vm203_vm2, %v2841_v13 }
 0x1cd   :  { %2198 = vmatpush3.bf16.xpose.msra.mxu1 %v336_v17  ;;  %2199 = vmatprep.mubr.msk.bf16.mxu1 %vm2651_vm0, %v2650_v0  ;;  %v327_v17 = vld [vmem:[%s3170_s5] sm:$0xf] }
 0x1ce   :  { %2209 = vmatprep.subr.bf16.mxu1 %v2650_v0 }
 0x1d4   :  { %2200 = vmatmul.mubr.msk.bf16.vlgmr.msra.gmra.mrb[8].mxu1 %vm203_vm2, %v329_v18  ;;  %v508_v18 = vsel %vm459_vm4, %v327_v17, 0  ;;  %v2068_v17 = vld [vmem:[%s3170_s5 + $0x8] sm:$0xf] }
 0x1d5   :  { %2211 = vmatprep.mubr.msk.bf16.mxu1 %vm2651_vm0, %v2650_v0 }
 0x29f   :  { %v244_v19 = vpop.f32.mrb[4].mxu1 }
 0x2a0   :  { %v251_v21 = vmul.f32 0.35355338, %v244_v19  ;;  %v2189_v22 = vpop.f32.mrb[5].mxu1  ;;  %v2063_v19 = vld [vmem:[%s3170_s5 + $0x4] sm:$0xf] }
 0x2a1   :  { %v247_v23 = vpop.f32.mrb[6].mxu1 }
 0x2a2   :  { %v252_v25 = vmul.f32 0.35355338, %v247_v23  ;;  %v2190_v26 = vpop.f32.mrb[7].mxu1  ;;  %v253_v27 = vadd.f32 %v251_v21, %v2863_v20  ;;  %v461_v21 = vsel %vm459_vm4, %v2063_v19, 0 }
 0x2a3   :  { %2210 = vmatpush3.bf16.msra.mxu1 %v461_v21 }
 0x2a4   :  { %v256_v28 = vsel %vm255_vm3, %v253_v27, -inf  ;;  %v254_v29 = vadd.f32 %v252_v25, %v2868_v24  ;;  %2221 = vmatprep.subr.bf16.mxu1 %v2650_v0 }
 0x2a5   :  { %257 = vmax.xlane.f32.xlu1 %v256_v28 }
 0x2a6   :  { %v259_v30 = vsel %vm255_vm3, %v254_v29, -inf }
 0x2a7   :  { %260 = vmax.xlane.f32.xlu0 %v259_v30  ;;  %v372_v31 = vpop.f32.mrb[8].mxu1 }
 0x2a8   :  { %v379_v32 = vmul.f32 0.35355338, %v372_v31  ;;  %v2201_v33 = vpop.f32.mrb[9].mxu1 }
 0x2a9   :  { %v375_v34 = vpop.f32.mrb[10].mxu1 }
 0x2aa   :  { %v380_v35 = vmul.f32 0.35355338, %v375_v34  ;;  %v2202_v36 = vpop.f32.mrb[11].mxu1  ;;  %v381_v37 = vadd.f32 %v379_v32, %v2863_v20 }
 0x2ac   :  { %v383_v38 = vsel %vm255_vm3, %v381_v37, -inf  ;;  %v382_v39 = vadd.f32 %v380_v35, %v2868_v24 }
 0x2ad   :  { %384 = vmax.xlane.f32.xlu0 %v383_v38 }
 0x2ae   :  { %v386_v40 = vsel %vm255_vm3, %v382_v39, -inf }
 0x2af   :  { %387 = vmax.xlane.f32.xlu1 %v386_v40 }
 0x332   :  { %v258_v41 = vpop.xlane.xlu1 %257 }
 0x333   :  { %v262_v42 = vsub.f32 %v253_v27, %v258_v41 }
 0x334   :  { %v261_v43 = vpop.xlane.xlu0 %260 }
 0x335   :  { %v264_v44 = vmul.f32 1.442695, %v262_v42  ;;  %v263_v45 = vsub.f32 %v254_v29, %v261_v43 }
 0x337   :  { %2400 = vpow2.f32 %v264_v44  ;;  %v266_v46 = vmul.f32 1.442695, %v263_v45 }
 0x339   :  { %2402 = vpow2.f32 %v266_v46 }
 0x33a   :  { %v385_v47 = vpop.xlane.xlu0 %384 }
 0x33b   :  { %v389_v48 = vsub.f32 %v381_v37, %v385_v47 }
 0x33c   :  { %v388_v49 = vpop.xlane.xlu1 %387 }
 0x33d   :  { %v391_v50 = vmul.f32 1.442695, %v389_v48  ;;  %v390_v51 = vsub.f32 %v382_v39, %v388_v49 }
 0x33f   :  { %2404 = vpow2.f32 %v391_v50  ;;  %v393_v52 = vmul.f32 1.442695, %v390_v51 }
 0x341   :  { %v2401_v53 = vpop.eup %2400  ;;  %2406 = vpow2.f32 %v393_v52 }
 0x342   :  { %v268_v54 = vsel %vm255_vm3, %v2401_v53, 0.0 }
 0x343   :  { %v2403_v55 = vpop.eup %2402  ;;  %269 = vadd.xlane.f32.xlu0 %v268_v54 }
 0x344   :  { %v271_v56 = vsel %vm255_vm3, %v2403_v55, 0.0 }
 0x345   :  { %272 = vadd.xlane.f32.xlu1 %v271_v56 }
 0x349   :  { %v2405_v57 = vpop.eup %2404 }
 0x34a   :  { %v395_v58 = vsel %vm255_vm3, %v2405_v57, 0.0 }
 0x34b   :  { %v2407_v59 = vpop.eup %2406  ;;  %396 = vadd.xlane.f32.xlu0 %v395_v58 }
 0x34c   :  { %v398_v60 = vsel %vm255_vm3, %v2407_v59, 0.0 }
 0x34d   :  { %399 = vadd.xlane.f32.xlu1 %v398_v60 }
 0x35e   :  { %406 = vrot.lane.b32.xlu1 %v2841_v13, %s2655_s2 }
 0x361   :  { %279 = vrot.lane.b32.xlu0 %v2841_v13, %s2641_s13 }
 0x362   :  { %553 = vrot.lane.b32.xlu1 %v2841_v13, %s2656_s17 }
 0x365   :  { %551 = vrot.lane.b32.xlu0 %v2841_v13, %s2657_s19 }
 0x3d0   :  { %v270_v61 = vpop.xlane.xlu0 %269 }
 0x3d1   :  { %2408 = vrcp.f32 %v270_v61 }
 0x3d2   :  { %v273_v62 = vpop.xlane.xlu1 %272 }
 0x3d3   :  { %2410 = vrcp.f32 %v273_v62 }
 0x3d8   :  { %v397_v63 = vpop.xlane.xlu0 %396 }
 0x3d9   :  { %2412 = vrcp.f32 %v397_v63 }
 0x3da   :  { %v400_v1 = vpop.xlane.xlu1 %399 }
 0x3db   :  { %v2409_v2 = vpop.eup %2408  ;;  %2414 = vrcp.f32 %v400_v1 }
 0x3dc   :  { %v280_v5 = vpop.permute.xlu0 %279  ;;  %v276_v7 = vmul.f32 %v2409_v2, %v2401_v53 }
 0x3dd   :  { %v2411_v6 = vpop.eup %2410  ;;  %2192 = vmatpush3.bf16.msra.mxu0 %v280_v5 }
 0x3de   :  { %2203 = vmatprep.subr.bf16.mxu0 %v2650_v0  ;;  %v277_v8 = vmul.f32 %v2411_v6, %v2403_v55  ;;  %v407_v10 = vpop.permute.xlu1 %406 }
 0x3e0   :  { %v278_v9 = vpack.c.bf16 %v277_v8, %v276_v7  ;;  %v552_v35 = vpop.permute.xlu0 %551 }
 0x3e2   :  { %2194 = vmatmul.mubr.msk.bf16.vlgmr.msra.gmra.mrb[0].mxu0 %vm255_vm3, %v278_v9  ;;  %v554_v30 = vpop.permute.xlu1 %553 }
 0x3e3   :  { %v2413_v11 = vpop.eup %2412  ;;  %2204 = vmatpush3.bf16.msra.mxu0 %v407_v10  ;;  %2205 = vmatprep.mubr.msk.bf16.mxu0 %vm2651_vm0, %v2650_v0  ;;  %v559_v34 = vsel %vm203_vm2, %v554_v30, 0 }
 0x3e4   :  { %2215 = vmatprep.subr.bf16.mxu0 %v2650_v0  ;;  %v403_v14 = vmul.f32 %v2413_v11, %v2405_v57 }
 0x3e5   :  { %v2415_v12 = vpop.eup %2414 }
 0x3e6   :  { %v404_v15 = vmul.f32 %v2415_v12, %v2407_v59 }
 0x3e8   :  { %v405_v16 = vpack.c.bf16 %v404_v15, %v403_v14 }
 0x3ea   :  { %2206 = vmatmul.mubr.msk.bf16.vlgmr.msra.gmra.mrb[4].mxu0 %vm255_vm3, %v405_v16 }
 0x3eb   :  { %2217 = vmatprep.mubr.msk.bf16.mxu0 %vm2651_vm0, %v2650_v0  ;;  %2216 = vmatpush3.bf16.msra.mxu0 %v508_v18  ;;  %v683_v18 = vsel %vm459_vm4, %v2068_v17, 0 }
 0x3ec   :  { %2227 = vmatprep.subr.bf16.mxu0 %v2650_v0 }
 0x4b5   :  { %v319_v22 = vpop.f32.mrb[0].mxu0 }
 0x4b6   :  { %v2195_v23 = vpop.f32.mrb[1].mxu0 }
 0x4b7   :  { %v322_v25 = vpop.f32.mrb[2].mxu0 }
 0x4b8   :  { %v326_v26 = vpack.c.bf16 %v322_v25, %v319_v22  ;;  %v2196_v27 = vpop.f32.mrb[3].mxu0 }
 0x4ba   :  { %2218 = vmatmul.mubr.msk.bf16.vlgmr.msra.gmra.mrb[8].mxu0 %vm203_vm2, %v326_v26 }
 0x4bb   :  { %2229 = vmatprep.mubr.msk.bf16.mxu0 %vm2651_vm0, %v2650_v0 }
 0x4bd   :  { %v446_v28 = vpop.f32.mrb[4].mxu0 }
 0x4be   :  { %v2207_v29 = vpop.f32.mrb[5].mxu0 }
 0x4bf   :  { %v449_v31 = vpop.f32.mrb[6].mxu0 }
 0x4c0   :  { %v453_v32 = vpack.c.bf16 %v449_v31, %v446_v28  ;;  %v2208_v33 = vpop.f32.mrb[7].mxu0 }
 0x4c2   :  { %2212 = vmatmul.mubr.msk.bf16.vlgmr.msra.gmra.mrb[12].mxu1 %vm203_vm2, %v453_v32 }
 0x4c3   :  { %2222 = vmatpush3.bf16.xpose.msra.mxu1 %v559_v34  ;;  %2223 = vmatprep.mubr.msk.bf16.mxu1 %vm2651_vm0, %v2650_v0 }
 0x4c4   :  { %2233 = vmatprep.subr.bf16.mxu1 %v2650_v0 }
 0x4ca   :  { %2224 = vmatmul.mubr.msk.bf16.vlgmr.msra.gmra.mrb[16].mxu1 %vm203_vm2, %v552_v35 }
 0x4cb   :  { %2235 = vmatprep.mubr.msk.bf16.mxu1 %vm2651_vm0, %v2650_v0  ;;  %2234 = vmatpush3.bf16.msra.mxu1 %v683_v18 }
 0x4cc   :  { %2245 = vmatprep.subr.bf16.mxu1 %v2650_v0 }
 0x58d   :  { %v544_v36 = vpop.f32.mrb[8].mxu0 }
 0x58e   :  { %v2219_v37 = vpop.f32.mrb[9].mxu0 }
 0x58f   :  { %v547_v38 = vpop.f32.mrb[10].mxu0 }
 0x590   :  { %v2220_v39 = vpop.f32.mrb[11].mxu0 }
 0x595   :  { %v497_v40 = vpop.f32.mrb[12].mxu1 }
 0x596   :  { %v2918_v41 = vadd.f32 %v544_v36, %v497_v40  ;;  %v2213_v42 = vpop.f32.mrb[13].mxu1 }
 0x597   :  { %v500_v43 = vpop.f32.mrb[14].mxu1 }
 0x598   :  { %v2920_v44 = vadd.f32 %v547_v38, %v500_v43  ;;  %v2214_v45 = vpop.f32.mrb[15].mxu1 }
 0x59d   :  { %v595_v46 = vpop.f32.mrb[16].mxu1 }
 0x59e   :  { %v602_v47 = vmul.f32 0.35355338, %v595_v46  ;;  %v2225_v48 = vpop.f32.mrb[17].mxu1 }
 0x59f   :  { %v598_v49 = vpop.f32.mrb[18].mxu1 }
 0x5a0   :  { %v603_v50 = vmul.f32 0.35355338, %v598_v49  ;;  %v2226_v51 = vpop.f32.mrb[19].mxu1  ;;  %v604_v52 = vadd.f32 %v602_v47, %v2863_v20 }
 0x5a2   :  { %v606_v53 = vsel %vm255_vm3, %v604_v52, -inf  ;;  %v605_v54 = vadd.f32 %v603_v50, %v2868_v24 }
 0x5a3   :  { %607 = vmax.xlane.f32.xlu1 %v606_v53 }
 0x5a4   :  { %v609_v55 = vsel %vm255_vm3, %v605_v54, -inf }
 0x5a5   :  { %610 = vmax.xlane.f32.xlu0 %v609_v55 }
 0x630   :  { %v608_v56 = vpop.xlane.xlu1 %607 }
 0x631   :  { %v612_v57 = vsub.f32 %v604_v52, %v608_v56 }
 0x632   :  { %v611_v58 = vpop.xlane.xlu0 %610 }
 0x633   :  { %v614_v59 = vmul.f32 1.442695, %v612_v57  ;;  %v613_v60 = vsub.f32 %v605_v54, %v611_v58 }
 0x635   :  { %2416 = vpow2.f32 %v614_v59  ;;  %v616_v61 = vmul.f32 1.442695, %v613_v60 }
 0x637   :  { %2418 = vpow2.f32 %v616_v61 }
 0x63f   :  { %v2417_v62 = vpop.eup %2416 }
 0x640   :  { %v618_v63 = vsel %vm255_vm3, %v2417_v62, 0.0 }
 0x641   :  { %v2419_v1 = vpop.eup %2418  ;;  %619 = vadd.xlane.f32.xlu0 %v618_v63 }
 0x642   :  { %v621_v2 = vsel %vm255_vm3, %v2419_v1, 0.0 }
 0x643   :  { %622 = vadd.xlane.f32.xlu1 %v621_v2 }
 0x654   :  { %730 = vrot.lane.b32.xlu1 %v2841_v13, %s2658_s23 }
 0x657   :  { %629 = vrot.lane.b32.xlu0 %v2841_v13, %s2659_s24 }
 0x658   :  { %728 = vrot.lane.b32.xlu1 %v2841_v13, %s2660_s25 }
 0x6ce   :  { %v620_v5 = vpop.xlane.xlu0 %619 }
 0x6cf   :  { %2420 = vrcp.f32 %v620_v5 }
 0x6d0   :  { %v623_v6 = vpop.xlane.xlu1 %622 }
 0x6d1   :  { %2422 = vrcp.f32 %v623_v6 }
 0x6d2   :  { %v630_v7 = vpop.permute.xlu0 %629 }
 0x6d3   :  { %2228 = vmatpush3.bf16.msra.mxu0 %v630_v7 }
 0x6d4   :  { %2239 = vmatprep.subr.bf16.mxu0 %v2650_v0  ;;  %v731_v12 = vpop.permute.xlu1 %730 }
 0x6d5   :  { %v736_v15 = vsel %vm203_vm2, %v731_v12, 0 }
 0x6d8   :  { %v729_v16 = vpop.permute.xlu1 %728 }
 0x6d9   :  { %v2421_v8 = vpop.eup %2420 }
 0x6da   :  { %v626_v10 = vmul.f32 %v2421_v8, %v2417_v62 }
 0x6db   :  { %v2423_v9 = vpop.eup %2422 }
 0x6dc   :  { %v627_v11 = vmul.f32 %v2423_v9, %v2419_v1  ;;  %v2074_v1 = vld [vmem:[#allocation11 + $0x3] ss:$0 sm:$0xff] }
 0x6de   :  { %v628_v14 = vpack.c.bf16 %v627_v11, %v626_v10 }
 0x6e0   :  { %2230 = vmatmul.mubr.msk.bf16.vlgmr.msra.gmra.mrb[12].mxu0 %vm255_vm3, %v628_v14 }
 0x6e1   :  { %2240 = vmatpush3.bf16.xpose.msra.mxu0 %v736_v15  ;;  %2241 = vmatprep.mubr.msk.bf16.mxu0 %vm2651_vm0, %v2650_v0 }
 0x6e2   :  { %2251 = vmatprep.subr.bf16.mxu0 %v2650_v0 }
 0x6e8   :  { %2242 = vmatmul.mubr.msk.bf16.vlgmr.msra.gmra.mrb[16].mxu0 %vm203_vm2, %v729_v16 }
 0x6e9   :  { %2253 = vmatprep.mubr.msk.bf16.mxu0 %vm2651_vm0, %v2650_v0 }
 0x7b3   :  { %v669_v19 = vpop.f32.mrb[12].mxu0 }
 0x7b4   :  { %v2231_v21 = vpop.f32.mrb[13].mxu0 }
 0x7b5   :  { %v672_v22 = vpop.f32.mrb[14].mxu0 }
 0x7b6   :  { %v676_v23 = vpack.c.bf16 %v672_v22, %v669_v19  ;;  %v2232_v25 = vpop.f32.mrb[15].mxu0 }
 0x7b8   :  { %2236 = vmatmul.mubr.msk.bf16.vlgmr.msra.gmra.mrb[20].mxu1 %vm203_vm2, %v676_v23 }
 0x7b9   :  { %2247 = vmatprep.mubr.msk.bf16.mxu1 %vm2651_vm0, %v2650_v0 }
 0x7bb   :  { %v772_v26 = vpop.f32.mrb[16].mxu0 }
 0x7bc   :  { %v779_v27 = vmul.f32 0.35355338, %v772_v26  ;;  %v2243_v28 = vpop.f32.mrb[17].mxu0 }
 0x7bd   :  { %v775_v29 = vpop.f32.mrb[18].mxu0  ;;  %v2390_v28 = vld [vmem:[#allocation8] sm:$0xff]  }
 0x7be   :  { %v780_v30 = vmul.f32 0.35355338, %v775_v29  ;;  %v2244_v31 = vpop.f32.mrb[19].mxu0  ;;  %v781_v32 = vadd.f32 %v779_v27, %v2863_v20  ;;  %v127_v29 = vld [vmem:[%s3166_s1] sm:$0xff] }
 0x7c0   :  { %v783_v33 = vsel %vm255_vm3, %v781_v32, -inf  ;;  %v782_v34 = vadd.f32 %v780_v30, %v2868_v24  ;;  %v128_v30 = vld [vmem:[%s3166_s1 + $0x8] sm:$0xff] }
 0x7c1   :  { %784 = vmax.xlane.f32.xlu0 %v783_v33  ;;  %v1020_v31 = vpack.c.bf16 %v128_v30, %v127_v29  ;;  %v2393_v33 = vld [vmem:[#allocation7 + $0x8] sm:$0xff]  }
 0x7c2   :  { %v786_v35 = vsel %vm255_vm3, %v782_v34, -inf }
 0x7c3   :  { %787 = vmax.xlane.f32.xlu1 %v786_v35 }
 0x7d4   :  { %806 = vrot.lane.b32.xlu1 %v2841_v13, %s2661_s14  ;;  %v2072_v13 = vld [vmem:[%s3170_s5 + $0xc] sm:$0xf] }
 0x7d5   :  { %v860_v47 = vsel %vm459_vm4, %v2072_v13, 0 }
 0x7d6   :  { %2252 = vmatpush3.bf16.msra.mxu0 %v860_v47 }
 0x7d7   :  { %2265 = vmatprep.subr.bf16.mxu0 %v2650_v0 }
 0x84e   :  { %v785_v36 = vpop.xlane.xlu0 %784 }
 0x84f   :  { %v789_v37 = vsub.f32 %v781_v32, %v785_v36  ;;  %v2392_v32 = vld [vmem:[#allocation7] sm:$0xff]  }
 0x850   :  { %v788_v38 = vpop.xlane.xlu1 %787 }
 0x851   :  { %v791_v39 = vmul.f32 1.442695, %v789_v37  ;;  %v790_v40 = vsub.f32 %v782_v34, %v788_v38 }
 0x853   :  { %2424 = vpow2.f32 %v791_v39  ;;  %v793_v42 = vmul.f32 1.442695, %v790_v40 }
 0x854   :  { %v807_v43 = vpop.permute.xlu1 %806 }
 0x855   :  { %2426 = vpow2.f32 %v793_v42  ;;  %2246 = vmatpush3.bf16.msra.mxu1 %v807_v43  ;;  %v2075_v43 = vld [vmem:[#allocation11 + $0x7] ss:$0 sm:$0xff] }
 0x856   :  { %2257 = vmatprep.subr.bf16.mxu1 %v2650_v0 }
 0x85d   :  { %v2425_v20 = vpop.eup %2424 }
 0x85e   :  { %v795_v24 = vsel %vm255_vm3, %v2425_v20, 0.0 }
 0x85f   :  { %v2427_v45 = vpop.eup %2426  ;;  %796 = vadd.xlane.f32.xlu0 %v795_v24 }
 0x860   :  { %v798_v46 = vsel %vm255_vm3, %v2427_v45, 0.0 }
 0x863   :  { %799 = vadd.xlane.f32.xlu0 %v798_v46  ;;  %v2076_v46 = vld [vmem:[#allocation11 + $0x8] ss:$0 sm:$0xff] }
 0x88b   :  { %v719_v48 = vpop.f32.mrb[20].mxu1 }
 0x88c   :  { %v726_v49 = vadd.f32 %v719_v48, %v2918_v41  ;;  %v2237_v50 = vpop.f32.mrb[21].mxu1 }
 0x88d   :  { %v722_v51 = vpop.f32.mrb[22].mxu1  ;;  %v2081_v50 = vld [vmem:[#allocation11 + $0x1] ss:$0 sm:$0xff] }
 0x88e   :  { %v727_v52 = vadd.f32 %v722_v51, %v2920_v44  ;;  %v2238_v53 = vpop.f32.mrb[23].mxu1 }
 0x8ec   :  { %v797_v54 = vpop.xlane.xlu0 %796 }
 0x8ed   :  { %2428 = vrcp.f32 %v797_v54 }
 0x8f0   :  { %v800_v55 = vpop.xlane.xlu0 %799 }
 0x8f1   :  { %2430 = vrcp.f32 %v800_v55 }
 0x8f7   :  { %v2429_v56 = vpop.eup %2428 }
 0x8f8   :  { %v803_v58 = vmul.f32 %v2429_v56, %v2425_v20 }
 0x8fb   :  { %v2431_v57 = vpop.eup %2430 }
 0x8fc   :  { %v804_v59 = vmul.f32 %v2431_v57, %v2427_v45 }
 0x8fe   :  { %v805_v60 = vpack.c.bf16 %v804_v59, %v803_v58  ;;  %v2077_v59 = vld [vmem:[#allocation11 + $0x4] ss:$0 sm:$0xff] }
 0x900   :  { %2248 = vmatmul.mubr.msk.bf16.vlgmr.msra.gmra.mrb[24].mxu1 %vm255_vm3, %v805_v60 }
 0x901   :  { %2261 = vmatprep.mubr.msk.bf16.mxu1 %vm2651_vm0, %v2650_v0  ;;  %2258 = vmatpush3.bf16.msra.mxu1 %v2392_v32 }
 0x902   :  { %2259 = vmatprep.subr.bf16.mxu1 %v2650_v0 }
 0x905   :  { %2260 = vmatpush3.bf16.msra.mxu1 %v2393_v33 }
 0x906   :  { %2273 = vmatprep.subr.bf16.mxu1 %v2650_v0 }
 0x9d3   :  { %v846_v41 = vpop.f32.mrb[24].mxu1 }
 0x9d4   :  { %v2249_v61 = vpop.f32.mrb[25].mxu1 }
 0x9d5   :  { %v849_v62 = vpop.f32.mrb[26].mxu1 }
 0x9d6   :  { %v853_v63 = vpack.c.bf16 %v849_v62, %v846_v41  ;;  %v2250_v44 = vpop.f32.mrb[27].mxu1 }
 0x9d8   :  { %2254 = vmatmul.mubr.msk.bf16.vlgmr.msra.gmra.mrb[20].mxu0 %vm203_vm2, %v853_v63 }
 0x9d9   :  { %2269 = vmatprep.mubr.msk.bf16.mxu0 %vm2651_vm0, %v2650_v0  ;;  %2266 = vmatpush3.bf16.msra.mxu0 %v2390_v28 }
 0x9da   :  { %2267 = vmatprep.subr.bf16.mxu0 %v2650_v0 }
 0xaab   :  { %v896_v2 = vpop.f32.mrb[20].mxu0 }
 0xaac   :  { %v903_v5 = vadd.f32 %v896_v2, %v726_v49  ;;  %v2255_v6 = vpop.f32.mrb[21].mxu0 }
 0xaad   :  { %v899_v7 = vpop.f32.mrb[22].mxu0 }
 0xaae   :  { %v909_v8 = vadd.f32 %v2074_v1, %v903_v5  ;;  %v904_v9 = vadd.f32 %v899_v7, %v727_v52  ;;  %v2256_v10 = vpop.f32.mrb[23].mxu0 }
 0xab0   :  { %v910_v11 = vadd.f32 %v2074_v1, %v904_v9  ;;  %v911_v12 = vadd.f32 %v909_v8, %v2827_v3  ;;  %v3019_v8 = vld [vmem:[#allocation2] sm:$0xff] }
 0xab2   :  { %v915_v14 = vsel %vm151_vm1, %v911_v12, 0.0  ;;  %v912_v15 = vadd.f32 %v910_v11, %v2832_v4  ;;  %v2391_v4 = vld [vmem:[#allocation8 + $0x8] sm:$0xff]  }
 0xab3   :  { %916 = vadd.xlane.f32.xlu0 %v915_v14  ;;  %2268 = vmatpush3.bf16.msra.mxu0 %v2391_v4 }
 0xab4   :  { %v918_v16 = vsel %vm151_vm1, %v912_v15, 0.0  ;;  %2279 = vmatprep.subr.bf16.mxu0 %v2650_v0 }
 0xab6   :  { %2270 = vmatmul.mubr.msk.bf16.vlgmr.msra.gmra.mrb[24].mxu0 %vm151_vm1, %v1020_v31 }
 0xab7   :  { %919 = vadd.xlane.f32.xlu0 %v918_v16  ;;  %2281 = vmatprep.mubr.msk.bf16.mxu0 %vm2651_vm0, %v2650_v0 }
 0xb40   :  { %v917_v17 = vpop.xlane.xlu0 %916 }
 0xb41   :  { %v922_v18 = vmul.f32 0.03125, %v917_v17 }
 0xb43   :  { %v924_v19 = vsub.f32 %v911_v12, %v922_v18  ;;  %v3021_v12 = vld [vmem:[#allocation2 + $0x8] sm:$0xff] }
 0xb44   :  { %v920_v21 = vpop.xlane.xlu0 %919 }
 0xb45   :  { %v923_v22 = vmul.f32 0.03125, %v920_v21  ;;  %v926_v23 = vmul.f32 %v924_v19, %v924_v19 }
 0xb47   :  { %v925_v25 = vsub.f32 %v912_v15, %v923_v22  ;;  %v928_v26 = vsel %vm151_vm1, %v926_v23, 0.0 }
 0xb48   :  { %929 = vadd.xlane.f32.xlu0 %v928_v26 }
 0xb49   :  { %v927_v27 = vmul.f32 %v925_v25, %v925_v25 }
 0xb4b   :  { %v931_v3 = vsel %vm151_vm1, %v927_v27, 0.0 }
 0xb4c   :  { %932 = vadd.xlane.f32.xlu0 %v931_v3 }
 0xb89   :  { %v1079_v51 = vpop.f32.mrb[24].mxu0 }
 0xb8a   :  { %v1080_v52 = vadd.f32 %v2081_v50, %v1079_v51  ;;  %v2271_v53 = vpop.f32.mrb[25].mxu0 }
 0xb8b   :  { %v1082_v54 = vpop.f32.mrb[26].mxu0 }
 0xb8c   :  { %v1083_v55 = vadd.f32 %v2081_v50, %v1082_v54  ;;  %v2272_v56 = vpop.f32.mrb[27].mxu0 }
 0xb8e   :  { %v2999_v57 = vpack.c.bf16 %v1083_v55, %v1080_v52 }
 0xb90   :  { %1218 = vrot.lane.b32.xlu1 %v2999_v57, %s2652_s0  ;;  %v1095_v58 = vsel %vm203_vm2, %v2999_v57, 0 }
 0xbd5   :  { %v930_v34 = vpop.xlane.xlu0 %929 }
 0xbd6   :  { %v934_v35 = vmul.f32 0.03125, %v930_v34 }
 0xbd8   :  { %v936_v36 = vadd.f32 1e-05, %v934_v35 }
 0xbd9   :  { %v933_v37 = vpop.xlane.xlu0 %932 }
 0xbda   :  { %2432 = vrsqrt.f32 %v936_v36  ;;  %v935_v38 = vmul.f32 0.03125, %v933_v37 }
 0xbdc   :  { %v937_v39 = vadd.f32 1e-05, %v935_v38 }
 0xbde   :  { %2434 = vrsqrt.f32 %v937_v39 }
 0xbe4   :  { %v2433_v40 = vpop.eup %2432 }
 0xbe5   :  { %v940_v42 = vmul.f32 %v2433_v40, %v924_v19 }
 0xbe7   :  { %v946_v24 = vmul.f32 %v2075_v43, %v940_v42 }
 0xbe8   :  { %v2435_v20 = vpop.eup %2434 }
 0xbe9   :  { %v941_v45 = vmul.f32 %v2435_v20, %v925_v25  ;;  %v2990_v47 = vadd.f32 %v2076_v46, %v946_v24 }
 0xbeb   :  { %v947_v13 = vmul.f32 %v2075_v43, %v941_v45 }
 0xbed   :  { %v2992_v48 = vadd.f32 %v2076_v46, %v947_v13 }
 0xbef   :  { %v954_v49 = vpack.c.bf16 %v2992_v48, %v2990_v47 }
 0xbf1   :  { %2262 = vmatmul.mubr.msk.bf16.vlgmr.msra.gmra.mrb[28].mxu1 %vm151_vm1, %v954_v49 }
 0xbf2   :  { %2275 = vmatprep.mubr.msk.bf16.mxu1 %vm2651_vm0, %v2650_v0  ;;  %2274 = vmatpush3.bf16.xpose.msra.mxu1 %v1095_v58 }
 0xbf3   :  { %2285 = vmatprep.subr.bf16.mxu1 %v2650_v0 }
 0xc02   :  { %v1219_v62 = vpop.permute.xlu1 %1218 }
 0xc03   :  { %v1224_v5 = vsel %vm203_vm2, %v1219_v62, 0 }
 0xcc4   :  { %v1013_v60 = vpop.f32.mrb[28].mxu1 }
 0xcc5   :  { %v2263_v41 = vpop.f32.mrb[29].mxu1  ;;  %v1014_v63 = vadd.f32 %v2077_v59, %v1013_v60 }
 0xcc6   :  { %v1016_v61 = vpop.f32.mrb[30].mxu1 }
 0xcc7   :  { %v1017_v44 = vadd.f32 %v2077_v59, %v1016_v61  ;;  %v2264_v1 = vpop.f32.mrb[31].mxu1 }
 0xcc9   :  { %v3006_v2 = vpack.c.bf16 %v1017_v44, %v1014_v63 }
 0xccb   :  { %1216 = vrot.lane.b32.xlu0 %v3006_v2, %s2652_s0  ;;  %2276 = vmatmul.mubr.msk.bf16.vlgmr.msra.gmra.mrb[32].mxu1 %vm203_vm2, %v3006_v2 }
 0xccc   :  { %2286 = vmatpush3.bf16.xpose.msra.mxu1 %v1224_v5  ;;  %2287 = vmatprep.mubr.msk.bf16.mxu1 %vm2651_vm0, %v2650_v0 }
 0xccd   :  { %2297 = vmatprep.subr.bf16.mxu1 %v2650_v0 }
 0xd3d   :  { %v1217_v6 = vpop.permute.xlu0 %1216 }
 0xd3e   :  { %2288 = vmatmul.mubr.msk.bf16.vlgmr.msra.gmra.mrb[36].mxu1 %vm203_vm2, %v1217_v6  ;;  %v1214_v6 = vld [vmem:[#allocation10] sm:$0xf] }
 0xd3f   :  { %2299 = vmatprep.mubr.msk.bf16.mxu1 %vm2651_vm0, %v2650_v0 }
 0xd9e   :  { %v1131_v7 = vpop.f32.mrb[32].mxu1 }
 0xd9f   :  { %v1138_v9 = vmul.f32 0.35355338, %v1131_v7  ;;  %v2277_v10 = vpop.f32.mrb[33].mxu1  ;;  %v1395_v7 = vsel %vm459_vm4, %v1214_v6, 0  ;;  %v1565_v6 = vld [vmem:[#allocation10 + $0x8] sm:$0xf] }
 0xda0   :  { %v1134_v11 = vpop.f32.mrb[34].mxu1 }
 0xda1   :  { %v1139_v14 = vmul.f32 0.35355338, %v1134_v11  ;;  %v2278_v15 = vpop.f32.mrb[35].mxu1  ;;  %v1140_v16 = vadd.f32 %v1138_v9, %v3019_v8  ;;  %v1343_v9 = vld [vmem:[#allocation10 + $0x4] sm:$0xf] }
 0xda2   :  { %v1348_v10 = vsel %vm459_vm4, %v1343_v9, 0 }
 0xda3   :  { %v1142_v17 = vsel %vm255_vm3, %v1140_v16, -inf  ;;  %v1141_v18 = vadd.f32 %v1139_v14, %v3021_v12  ;;  %2298 = vmatpush3.bf16.msra.mxu1 %v1348_v10 }
 0xda4   :  { %1143 = vmax.xlane.f32.xlu1 %v1142_v17  ;;  %2309 = vmatprep.subr.bf16.mxu1 %v2650_v0 }
 0xda5   :  { %v1145_v19 = vsel %vm255_vm3, %v1141_v18, -inf }
 0xda6   :  { %1146 = vmax.xlane.f32.xlu0 %v1145_v19 }
 0xe11   :  { %v1260_v21 = vpop.f32.mrb[36].mxu1 }
 0xe12   :  { %v1267_v22 = vmul.f32 0.35355338, %v1260_v21  ;;  %v2289_v23 = vpop.f32.mrb[37].mxu1 }
 0xe13   :  { %v1263_v25 = vpop.f32.mrb[38].mxu1 }
 0xe14   :  { %v1268_v26 = vmul.f32 0.35355338, %v1263_v25  ;;  %v2290_v27 = vpop.f32.mrb[39].mxu1  ;;  %v1269_v3 = vadd.f32 %v1267_v22, %v3019_v8 }
 0xe16   :  { %v1271_v28 = vsel %vm255_vm3, %v1269_v3, -inf  ;;  %v1270_v4 = vadd.f32 %v1268_v26, %v3021_v12 }
 0xe17   :  { %1272 = vmax.xlane.f32.xlu1 %v1271_v28 }
 0xe18   :  { %v1274_v29 = vsel %vm255_vm3, %v1270_v4, -inf }
 0xe1b   :  { %1275 = vmax.xlane.f32.xlu1 %v1274_v29 }
 0xe31   :  { %v1144_v30 = vpop.xlane.xlu1 %1143 }
 0xe32   :  { %v1148_v31 = vsub.f32 %v1140_v16, %v1144_v30 }
 0xe33   :  { %v1147_v32 = vpop.xlane.xlu0 %1146 }
 0xe34   :  { %v1150_v33 = vmul.f32 1.442695, %v1148_v31  ;;  %v1149_v34 = vsub.f32 %v1141_v18, %v1147_v32 }
 0xe36   :  { %2436 = vpow2.f32 %v1150_v33  ;;  %v1152_v35 = vmul.f32 1.442695, %v1149_v34 }
 0xe38   :  { %2438 = vpow2.f32 %v1152_v35 }
 0xe40   :  { %v2437_v36 = vpop.eup %2436 }
 0xe41   :  { %v1154_v37 = vsel %vm255_vm3, %v2437_v36, 0.0 }
 0xe42   :  { %v2439_v38 = vpop.eup %2438  ;;  %1155 = vadd.xlane.f32.xlu1 %v1154_v37 }
 0xe43   :  { %v1157_v39 = vsel %vm255_vm3, %v2439_v38, 0.0 }
 0xe46   :  { %1158 = vadd.xlane.f32.xlu1 %v1157_v39 }
 0xea4   :  { %v1273_v40 = vpop.xlane.xlu1 %1272 }
 0xea5   :  { %v1277_v42 = vsub.f32 %v1269_v3, %v1273_v40 }
 0xea7   :  { %v1279_v43 = vmul.f32 1.442695, %v1277_v42 }
 0xea8   :  { %v1276_v20 = vpop.xlane.xlu1 %1275 }
 0xea9   :  { %2440 = vpow2.f32 %v1279_v43  ;;  %v1278_v24 = vsub.f32 %v1270_v4, %v1276_v20 }
 0xeab   :  { %v1281_v45 = vmul.f32 1.442695, %v1278_v24 }
 0xead   :  { %2442 = vpow2.f32 %v1281_v45 }
 0xeb3   :  { %v2441_v46 = vpop.eup %2440 }
 0xeb4   :  { %v1283_v13 = vsel %vm255_vm3, %v2441_v46, 0.0 }
 0xeb5   :  { %1284 = vadd.xlane.f32.xlu0 %v1283_v13 }
 0xeb7   :  { %v2443_v49 = vpop.eup %2442 }
 0xeb8   :  { %v1286_v50 = vsel %vm255_vm3, %v2443_v49, 0.0 }
 0xeb9   :  { %1287 = vadd.xlane.f32.xlu1 %v1286_v50 }
 0xeca   :  { %1294 = vrot.lane.b32.xlu1 %v2999_v57, %s2654_s30 }
 0xecb   :  { %1166 = vrot.lane.b32.xlu0 %v2999_v57, %s2653_s29 }
 0xece   :  { %1440 = vrot.lane.b32.xlu1 %v2999_v57, %s2657_s19 }
 0xecf   :  { %1438 = vrot.lane.b32.xlu0 %v3006_v2, %s2657_s19  ;;  %v1156_v51 = vpop.xlane.xlu1 %1155 }
 0xed3   :  { %v1159_v52 = vpop.xlane.xlu1 %1158 }
 0xed4   :  { %2444 = vrcp.f32 %v1159_v52 }
 0xed5   :  { %2446 = vrcp.f32 %v1156_v51 }
 0xede   :  { %v2445_v53 = vpop.eup %2444 }
 0xedf   :  { %v2447_v55 = vpop.eup %2446  ;;  %v1163_v56 = vmul.f32 %v2445_v53, %v2439_v38 }
 0xee0   :  { %v1162_v58 = vmul.f32 %v2447_v55, %v2437_v36 }
 0xee2   :  { %v1164_v41 = vpack.c.bf16 %v1163_v56, %v1162_v58 }
 0xf42   :  { %v1285_v54 = vpop.xlane.xlu0 %1284 }
 0xf43   :  { %2448 = vrcp.f32 %v1285_v54 }
 0xf46   :  { %v1167_v59 = vpop.permute.xlu0 %1166  ;;  %v1288_v60 = vpop.xlane.xlu1 %1287 }
 0xf47   :  { %2450 = vrcp.f32 %v1288_v60  ;;  %2280 = vmatpush3.bf16.msra.mxu0 %v1167_v59 }
 0xf48   :  { %2291 = vmatprep.subr.bf16.mxu0 %v2650_v0 }
 0xf4a   :  { %2282 = vmatmul.mubr.msk.bf16.vlgmr.msra.gmra.mrb[28].mxu0 %vm255_vm3, %v1164_v41  ;;  %v1295_v61 = vpop.permute.xlu1 %1294  ;;  %v1439_v27 = vpop.permute.xlu0 %1438 }
 0xf4b   :  { %2292 = vmatpush3.bf16.msra.mxu0 %v1295_v61  ;;  %2293 = vmatprep.mubr.msk.bf16.mxu0 %vm2651_vm0, %v2650_v0 }
 0xf4c   :  { %2303 = vmatprep.subr.bf16.mxu0 %v2650_v0 }
 0xf4d   :  { %v2449_v62 = vpop.eup %2448 }
 0xf4e   :  { %v1291_v44 = vmul.f32 %v2449_v62, %v2441_v46  ;;  %v1441_v21 = vpop.permute.xlu1 %1440 }
 0xf4f   :  { %v1446_v26 = vsel %vm203_vm2, %v1441_v21, 0 }
 0xf51   :  { %v2451_v63 = vpop.eup %2450 }
 0xf52   :  { %v1292_v1 = vmul.f32 %v2451_v63, %v2443_v49 }
 0xf54   :  { %v1293_v5 = vpack.c.bf16 %v1292_v1, %v1291_v44 }
 0xf56   :  { %2294 = vmatmul.mubr.msk.bf16.vlgmr.msra.gmra.mrb[32].mxu0 %vm255_vm3, %v1293_v5 }
 0xf57   :  { %2305 = vmatprep.mubr.msk.bf16.mxu0 %vm2651_vm0, %v2650_v0  ;;  %2304 = vmatpush3.bf16.msra.mxu0 %v1395_v7  ;;  %v1570_v7 = vsel %vm459_vm4, %v1565_v6, 0 }
 0xf58   :  { %2315 = vmatprep.subr.bf16.mxu0 %v2650_v0 }
0x101d   :  { %v1206_v11 = vpop.f32.mrb[28].mxu0 }
0x101e   :  { %v2283_v14 = vpop.f32.mrb[29].mxu0 }
0x101f   :  { %v1209_v15 = vpop.f32.mrb[30].mxu0 }
0x1020   :  { %v1213_v16 = vpack.c.bf16 %v1209_v15, %v1206_v11  ;;  %v2284_v17 = vpop.f32.mrb[31].mxu0 }
0x1022   :  { %2306 = vmatmul.mubr.msk.bf16.vlgmr.msra.gmra.mrb[36].mxu0 %vm203_vm2, %v1213_v16 }
0x1023   :  { %2317 = vmatprep.mubr.msk.bf16.mxu0 %vm2651_vm0, %v2650_v0 }
0x1029   :  { %v1334_v18 = vpop.f32.mrb[32].mxu0 }
0x102a   :  { %v2295_v19 = vpop.f32.mrb[33].mxu0 }
0x102b   :  { %v1337_v22 = vpop.f32.mrb[34].mxu0 }
0x102c   :  { %v1341_v23 = vpack.c.bf16 %v1337_v22, %v1334_v18  ;;  %v2296_v25 = vpop.f32.mrb[35].mxu0 }
0x102e   :  { %2300 = vmatmul.mubr.msk.bf16.vlgmr.msra.gmra.mrb[40].mxu1 %vm203_vm2, %v1341_v23 }
0x102f   :  { %2310 = vmatpush3.bf16.xpose.msra.mxu1 %v1446_v26  ;;  %2311 = vmatprep.mubr.msk.bf16.mxu1 %vm2651_vm0, %v2650_v0 }
0x1030   :  { %2321 = vmatprep.subr.bf16.mxu1 %v2650_v0 }
0x1036   :  { %2312 = vmatmul.mubr.msk.bf16.vlgmr.msra.gmra.mrb[44].mxu1 %vm203_vm2, %v1439_v27 }
0x1037   :  { %2323 = vmatprep.mubr.msk.bf16.mxu1 %vm2651_vm0, %v2650_v0  ;;  %2322 = vmatpush3.bf16.msra.mxu1 %v1570_v7 }
0x1038   :  { %2333 = vmatprep.subr.bf16.mxu1 %v2650_v0 }
0x10f5   :  { %v1431_v3 = vpop.f32.mrb[36].mxu0 }
0x10f6   :  { %v2307_v28 = vpop.f32.mrb[37].mxu0 }
0x10f7   :  { %v1434_v4 = vpop.f32.mrb[38].mxu0 }
0x10f8   :  { %v2308_v29 = vpop.f32.mrb[39].mxu0 }
0x1101   :  { %v1384_v30 = vpop.f32.mrb[40].mxu1 }
0x1102   :  { %v3066_v31 = vadd.f32 %v1431_v3, %v1384_v30  ;;  %v2301_v32 = vpop.f32.mrb[41].mxu1 }
0x1103   :  { %v1387_v33 = vpop.f32.mrb[42].mxu1 }
0x1104   :  { %v3068_v34 = vadd.f32 %v1434_v4, %v1387_v33  ;;  %v2302_v35 = vpop.f32.mrb[43].mxu1 }
0x1109   :  { %v1482_v36 = vpop.f32.mrb[44].mxu1 }
0x110a   :  { %v1489_v37 = vmul.f32 0.35355338, %v1482_v36  ;;  %v2313_v38 = vpop.f32.mrb[45].mxu1 }
0x110b   :  { %v1485_v39 = vpop.f32.mrb[46].mxu1 }
0x110c   :  { %v1490_v40 = vmul.f32 0.35355338, %v1485_v39  ;;  %v2314_v42 = vpop.f32.mrb[47].mxu1  ;;  %v1491_v43 = vadd.f32 %v1489_v37, %v3019_v8 }
0x110e   :  { %v1493_v20 = vsel %vm255_vm3, %v1491_v43, -inf  ;;  %v1492_v24 = vadd.f32 %v1490_v40, %v3021_v12 }
0x110f   :  { %1494 = vmax.xlane.f32.xlu1 %v1493_v20 }
0x1110   :  { %v1496_v45 = vsel %vm255_vm3, %v1492_v24, -inf }
0x1111   :  { %1497 = vmax.xlane.f32.xlu0 %v1496_v45 }
0x119c   :  { %v1495_v46 = vpop.xlane.xlu1 %1494 }
0x119d   :  { %v1499_v13 = vsub.f32 %v1491_v43, %v1495_v46 }
0x119e   :  { %v1498_v49 = vpop.xlane.xlu0 %1497 }
0x119f   :  { %v1501_v50 = vmul.f32 1.442695, %v1499_v13  ;;  %v1500_v51 = vsub.f32 %v1492_v24, %v1498_v49 }
0x11a1   :  { %2452 = vpow2.f32 %v1501_v50  ;;  %v1503_v52 = vmul.f32 1.442695, %v1500_v51 }
0x11a3   :  { %2454 = vpow2.f32 %v1503_v52 }
0x11ab   :  { %v2453_v53 = vpop.eup %2452 }
0x11ac   :  { %v1505_v54 = vsel %vm255_vm3, %v2453_v53, 0.0 }
0x11ad   :  { %v2455_v55 = vpop.eup %2454  ;;  %1506 = vadd.xlane.f32.xlu0 %v1505_v54 }
0x11ae   :  { %v1508_v56 = vsel %vm255_vm3, %v2455_v55, 0.0 }
0x11af   :  { %1509 = vadd.xlane.f32.xlu1 %v1508_v56 }
0x11c0   :  { %1617 = vrot.lane.b32.xlu1 %v2999_v57, %s2660_s25 }
0x11c3   :  { %1516 = vrot.lane.b32.xlu0 %v2999_v57, %s2656_s17 }
0x11c4   :  { %1615 = vrot.lane.b32.xlu1 %v3006_v2, %s2660_s25 }
0x123a   :  { %v1507_v58 = vpop.xlane.xlu0 %1506 }
0x123b   :  { %2456 = vrcp.f32 %v1507_v58 }
0x123c   :  { %v1510_v59 = vpop.xlane.xlu1 %1509 }
0x123d   :  { %2458 = vrcp.f32 %v1510_v59 }
0x123e   :  { %v1517_v60 = vpop.permute.xlu0 %1516 }
0x123f   :  { %2316 = vmatpush3.bf16.msra.mxu0 %v1517_v60 }
0x1240   :  { %2327 = vmatprep.subr.bf16.mxu0 %v2650_v0  ;;  %v1618_v44 = vpop.permute.xlu1 %1617 }
0x1241   :  { %v1623_v5 = vsel %vm203_vm2, %v1618_v44, 0 }
0x1244   :  { %v1616_v2 = vpop.permute.xlu1 %1615 }
0x1245   :  { %v2457_v41 = vpop.eup %2456 }
0x1246   :  { %v1513_v62 = vmul.f32 %v2457_v41, %v2453_v53 }
0x1247   :  { %v2459_v61 = vpop.eup %2458 }
0x1248   :  { %v1514_v63 = vmul.f32 %v2459_v61, %v2455_v55  ;;  %v2097_v55 = vld [vmem:[#allocation11 + $0x5] ss:$0 sm:$0xff] }
0x124a   :  { %v1515_v1 = vpack.c.bf16 %v1514_v63, %v1513_v62 }
0x124c   :  { %2318 = vmatmul.mubr.msk.bf16.vlgmr.msra.gmra.mrb[40].mxu0 %vm255_vm3, %v1515_v1 }
0x124d   :  { %2328 = vmatpush3.bf16.xpose.msra.mxu0 %v1623_v5  ;;  %2329 = vmatprep.mubr.msk.bf16.mxu0 %vm2651_vm0, %v2650_v0 }
0x124e   :  { %2339 = vmatprep.subr.bf16.mxu0 %v2650_v0 }
0x1254   :  { %2330 = vmatmul.mubr.msk.bf16.vlgmr.msra.gmra.mrb[44].mxu0 %vm203_vm2, %v1616_v2 }
0x1255   :  { %2341 = vmatprep.mubr.msk.bf16.mxu0 %vm2651_vm0, %v2650_v0 }
0x131f   :  { %v1556_v9 = vpop.f32.mrb[40].mxu0 }
0x1320   :  { %v2319_v10 = vpop.f32.mrb[41].mxu0 }
0x1321   :  { %v1559_v11 = vpop.f32.mrb[42].mxu0 }
0x1322   :  { %v1563_v14 = vpack.c.bf16 %v1559_v11, %v1556_v9  ;;  %v2320_v15 = vpop.f32.mrb[43].mxu0 }
0x1324   :  { %2324 = vmatmul.mubr.msk.bf16.vlgmr.msra.gmra.mrb[48].mxu1 %vm203_vm2, %v1563_v14 }
0x1325   :  { %2335 = vmatprep.mubr.msk.bf16.mxu1 %vm2651_vm0, %v2650_v0 }
0x1327   :  { %v1659_v16 = vpop.f32.mrb[44].mxu0 }
0x1328   :  { %v1666_v17 = vmul.f32 0.35355338, %v1659_v16  ;;  %v2331_v18 = vpop.f32.mrb[45].mxu0 }
0x1329   :  { %v1662_v19 = vpop.f32.mrb[46].mxu0  ;;  %v2395_v18 = vld [vmem:[%s3174_s9 + $0x8] sm:$0xff]  }
0x132a   :  { %v1667_v21 = vmul.f32 0.35355338, %v1662_v19  ;;  %v2332_v22 = vpop.f32.mrb[47].mxu0  ;;  %v1668_v23 = vadd.f32 %v1666_v17, %v3019_v8  ;;  %v2396_v19 = vld [vmem:[%s3175_s10] sm:$0xff]  }
0x132c   :  { %v1670_v25 = vsel %vm255_vm3, %v1668_v23, -inf  ;;  %v1669_v26 = vadd.f32 %v1667_v21, %v3021_v12  ;;  %v2397_v21 = vld [vmem:[%s3175_s10 + $0x8] sm:$0xff]  }
0x132d   :  { %1671 = vmax.xlane.f32.xlu0 %v1670_v25 }
0x132e   :  { %v1673_v27 = vsel %vm255_vm3, %v1669_v26, -inf }
0x132f   :  { %1674 = vmax.xlane.f32.xlu1 %v1673_v27 }
0x1340   :  { %1693 = vrot.lane.b32.xlu1 %v2999_v57, %s2658_s23  ;;  %v1742_v57 = vld [vmem:[#allocation10 + $0xc] sm:$0xf] }
0x1341   :  { %v1747_v37 = vsel %vm459_vm4, %v1742_v57, 0 }
0x1342   :  { %2340 = vmatpush3.bf16.msra.mxu0 %v1747_v37  ;;  %v2398_v37 = vld [vmem:[%s3175_s10 + $0x10] sm:$0xff]  }
0x1343   :  { %2353 = vmatprep.subr.bf16.mxu0 %v2650_v0 }
0x13ba   :  { %v1672_v3 = vpop.xlane.xlu0 %1671 }
0x13bb   :  { %v1676_v28 = vsub.f32 %v1668_v23, %v1672_v3 }
0x13bc   :  { %v1675_v4 = vpop.xlane.xlu1 %1674 }
0x13bd   :  { %v1678_v29 = vmul.f32 1.442695, %v1676_v28  ;;  %v1677_v30 = vsub.f32 %v1669_v26, %v1675_v4 }
0x13bf   :  { %2460 = vpow2.f32 %v1678_v29  ;;  %v1680_v32 = vmul.f32 1.442695, %v1677_v30  ;;  %v2098_v29 = vld [vmem:[#allocation11 + $0x9] ss:$0 sm:$0xff] }
0x13c0   :  { %v1694_v33 = vpop.permute.xlu1 %1693 }
0x13c1   :  { %2462 = vpow2.f32 %v1680_v32  ;;  %2334 = vmatpush3.bf16.msra.mxu1 %v1694_v33 }
0x13c2   :  { %2345 = vmatprep.subr.bf16.mxu1 %v2650_v0 }
0x13c9   :  { %v2461_v8 = vpop.eup %2460 }
0x13ca   :  { %v1682_v12 = vsel %vm255_vm3, %v2461_v8, 0.0 }
0x13cb   :  { %v2463_v35 = vpop.eup %2462  ;;  %1683 = vadd.xlane.f32.xlu0 %v1682_v12 }
0x13cc   :  { %v1685_v36 = vsel %vm255_vm3, %v2463_v35, 0.0 }
0x13cf   :  { %1686 = vadd.xlane.f32.xlu0 %v1685_v36 }
0x13f7   :  { %v1606_v38 = vpop.f32.mrb[48].mxu1 }
0x13f8   :  { %v1613_v39 = vadd.f32 %v1606_v38, %v3066_v31  ;;  %v2325_v40 = vpop.f32.mrb[49].mxu1  ;;  %v2399_v38 = vld [vmem:[%s3175_s10 + $0x18] sm:$0xff]   ;;  %s2662_s10 = smov [#allocation13]  }
0x13f9   :  { %v1609_v42 = vpop.f32.mrb[50].mxu1  ;;  %s2040_s21 = sshll.u32 %s2662_s10, 4  ;;  %s2041_s21 = int_to_ptr.vmem [resolvable:$true] %s2040_s21 }
0x13fa   :  { %v1614_v43 = vadd.f32 %v1609_v42, %v3068_v34  ;;  %v2326_v20 = vpop.f32.mrb[51].mxu1  ;;  %s2608_s3 = scalar_lea.vmem %s2041_s21, 256  ;;  %p2613_p7 = scmp.lt.s32.totalorder %s2041_s21, %s2041_s21 }
0x13fb   :  { %p2609_p6 = scmp.ne.s32.totalorder %s2041_s21, %s2608_s3  ;;  %p2614_p8 = scmp.lt.s32.totalorder %s2608_s3, %s2608_s3 }
0x13fd   :  { %p2615_p9 = por %p2614_p8, %p2613_p7 }
0x13ff   :  { %p2616_p10 = pnand %p2615_p9, %p2609_p6 }
0x1458   :  { %v1684_v24 = vpop.xlane.xlu0 %1683 }
0x1459   :  { %2464 = vrcp.f32 %v1684_v24 }
0x145c   :  { %v1687_v45 = vpop.xlane.xlu0 %1686 }
0x145d   :  { %2466 = vrcp.f32 %v1687_v45 }
0x1463   :  { %v2465_v46 = vpop.eup %2464 }
0x1464   :  { %v1690_v49 = vmul.f32 %v2465_v46, %v2461_v8  ;;  %v2099_v8 = vld [vmem:[#allocation11 + $0xa] ss:$0 sm:$0xff] }
0x1467   :  { %v2467_v13 = vpop.eup %2466 }
0x1468   :  { %v1691_v50 = vmul.f32 %v2467_v13, %v2463_v35 }
0x146a   :  { %v1692_v51 = vpack.c.bf16 %v1691_v50, %v1690_v49  ;;  %v2104_v50 = vld [vmem:[#allocation11 + $0x6] ss:$0 sm:$0xff] }
0x146c   :  { %2336 = vmatmul.mubr.msk.bf16.vlgmr.msra.gmra.mrb[52].mxu1 %vm255_vm3, %v1692_v51 }
0x146d   :  { %2349 = vmatprep.mubr.msk.bf16.mxu1 %vm2651_vm0, %v2650_v0 }
0x153f   :  { %v1733_v31 = vpop.f32.mrb[52].mxu1 }
0x1540   :  { %v2337_v52 = vpop.f32.mrb[53].mxu1 }
0x1541   :  { %v1736_v53 = vpop.f32.mrb[54].mxu1 }
0x1542   :  { %v1740_v54 = vpack.c.bf16 %v1736_v53, %v1733_v31  ;;  %v2338_v34 = vpop.f32.mrb[55].mxu1 }
0x1544   :  { %2342 = vmatmul.mubr.msk.bf16.vlgmr.msra.gmra.mrb[48].mxu0 %vm203_vm2, %v1740_v54 }
0x1545   :  { %2361 = vmatprep.mubr.msk.bf16.mxu0 %vm2651_vm0, %v2650_v0  ;;  %2354 = vmatpush3.bf16.msra.mxu0 %v2396_v19 }
0x1546   :  { %2355 = vmatprep.subr.bf16.mxu0 %v2650_v0 }
0x1549   :  { %2356 = vmatpush3.bf16.msra.mxu0 %v2397_v21 }
0x154a   :  { %2357 = vmatprep.subr.bf16.mxu0 %v2650_v0 }
0x154d   :  { %2358 = vmatpush3.bf16.msra.mxu0 %v2398_v37 }
0x154e   :  { %2359 = vmatprep.subr.bf16.mxu0 %v2650_v0 }
0x1551   :  { %2360 = vmatpush3.bf16.msra.mxu0 %v2399_v38 }
0x1617   :  { %v1783_v56 = vpop.f32.mrb[48].mxu0 }
0x1618   :  { %v1790_v58 = vadd.f32 %v1783_v56, %v1613_v39  ;;  %v2343_v59 = vpop.f32.mrb[49].mxu0  ;;  %v2100_v39 = vld [vmem:[#allocation11 + $0x2] ss:$0 sm:$0xff] }
0x1619   :  { %v1786_v60 = vpop.f32.mrb[50].mxu0 }
0x161a   :  { %v1796_v41 = vadd.f32 %v2097_v55, %v1790_v58  ;;  %v1791_v61 = vadd.f32 %v1786_v60, %v1614_v43  ;;  %v2344_v62 = vpop.f32.mrb[51].mxu0 }
0x161c   :  { %v1797_v63 = vadd.f32 %v2097_v55, %v1791_v61  ;;  %v1798_v44 = vadd.f32 %v1796_v41, %v2990_v47 }
0x161e   :  { %v1802_v1 = vsel %vm151_vm1, %v1798_v44, 0.0  ;;  %v1799_v5 = vadd.f32 %v1797_v63, %v2992_v48  ;;  %v2394_v48 = vld [vmem:[%s3174_s9] sm:$0xff]  }
0x161f   :  { %1803 = vadd.xlane.f32.xlu0 %v1802_v1  ;;  %2346 = vmatpush3.bf16.msra.mxu1 %v2394_v48 }
0x1620   :  { %v1805_v2 = vsel %vm151_vm1, %v1799_v5, 0.0  ;;  %2347 = vmatprep.subr.bf16.mxu1 %v2650_v0 }
0x1623   :  { %1806 = vadd.xlane.f32.xlu0 %v1805_v2  ;;  %2348 = vmatpush3.bf16.msra.mxu1 %v2395_v18 }
0x16ac   :  { %v1804_v6 = vpop.xlane.xlu0 %1803 }
0x16ad   :  { %v1808_v7 = vmul.f32 0.03125, %v1804_v6 }
0x16af   :  { %v1810_v9 = vsub.f32 %v1798_v44, %v1808_v7 }
0x16b0   :  { %v1807_v10 = vpop.xlane.xlu0 %1806 }
0x16b1   :  { %v1809_v11 = vmul.f32 0.03125, %v1807_v10  ;;  %v1812_v14 = vmul.f32 %v1810_v9, %v1810_v9 }
0x16b3   :  { %v1811_v15 = vsub.f32 %v1799_v5, %v1809_v11  ;;  %v1814_v16 = vsel %vm151_vm1, %v1812_v14, 0.0 }
0x16b4   :  { %1815 = vadd.xlane.f32.xlu0 %v1814_v16  ;;  %v2110_v16 = vld [vmem:[#allocation11 + $0xb] ss:$0 sm:$0xff] }
0x16b5   :  { %v1813_v17 = vmul.f32 %v1811_v15, %v1811_v15 }
0x16b7   :  { %v1817_v47 = vsel %vm151_vm1, %v1813_v17, 0.0 }
0x16b8   :  { %1818 = vadd.xlane.f32.xlu0 %v1817_v47  ;;  %v2111_v47 = vld [vmem:[#allocation11 + $0xc] ss:$0 sm:$0xff] }
0x1741   :  { %v1816_v22 = vpop.xlane.xlu0 %1815 }
0x1742   :  { %v1820_v23 = vmul.f32 0.03125, %v1816_v22 }
0x1744   :  { %v1822_v25 = vadd.f32 1e-05, %v1820_v23 }
0x1745   :  { %v1819_v26 = vpop.xlane.xlu0 %1818 }
0x1746   :  { %2468 = vrsqrt.f32 %v1822_v25  ;;  %v1821_v27 = vmul.f32 0.03125, %v1819_v26 }
0x1748   :  { %v1823_v3 = vadd.f32 1e-05, %v1821_v27 }
0x174a   :  { %2470 = vrsqrt.f32 %v1823_v3 }
0x1750   :  { %v2469_v28 = vpop.eup %2468 }
0x1751   :  { %v1826_v4 = vmul.f32 %v2469_v28, %v1810_v9 }
0x1753   :  { %v1832_v32 = vmul.f32 %v2098_v29, %v1826_v4 }
0x1754   :  { %v2471_v30 = vpop.eup %2470 }
0x1755   :  { %v1827_v33 = vmul.f32 %v2471_v30, %v1811_v15  ;;  %v1838_v35 = vadd.f32 %v2099_v8, %v1832_v32 }
0x1757   :  { %v1833_v12 = vmul.f32 %v2098_v29, %v1827_v33 }
0x1759   :  { %v1839_v36 = vadd.f32 %v2099_v8, %v1833_v12 }
0x175b   :  { %v1840_v57 = vpack.c.bf16 %v1839_v36, %v1838_v35 }
0x175d   :  { %2350 = vmatmul.mubr.msk.bf16.vlgmr.msra.gmra.mrb[56].mxu1 %vm151_vm1, %v1840_v57 }
0x1830   :  { %v1899_v40 = vpop.f32.mrb[56].mxu1 }
0x1831   :  { %v1900_v42 = vadd.f32 %v2100_v39, %v1899_v40  ;;  %v2351_v43 = vpop.f32.mrb[57].mxu1 }
0x1832   :  { %v1902_v20 = vpop.f32.mrb[58].mxu1 }
0x1833   :  { %v1903_v24 = vadd.f32 %v2100_v39, %v1902_v20  ;;  %v2352_v45 = vpop.f32.mrb[59].mxu1  ;;  %v1906_v46 = vmax.f32 %v1900_v42, 0.0 }
0x1835   :  { %v1907_v13 = vmax.f32 %v1903_v24, 0.0 }
0x1837   :  { %v1908_v49 = vpack.c.bf16 %v1907_v13, %v1906_v46 }
0x1839   :  { %2362 = vmatmul.mubr.msk.bf16.vlgmr.msra.gmra.mrb[52].mxu0 %vm1946_vm5, %v1908_v49 }
0x190c   :  { %v1984_v51 = vpop.f32.mrb[52].mxu0 }
0x190d   :  { %v1985_v0 = vadd.f32 %v2104_v50, %v1984_v51  ;;  %v2363_v31 = vpop.f32.mrb[53].mxu0 }
0x190e   :  { %v1987_v52 = vpop.f32.mrb[54].mxu0 }
0x190f   :  { %v1988_v53 = vadd.f32 %v2104_v50, %v1987_v52  ;;  %v2364_v54 = vpop.f32.mrb[55].mxu0  ;;  %v1991_v34 = vadd.f32 %v1985_v0, %v1838_v35 }
0x1911   :  { %v1995_v55 = vsel %vm151_vm1, %v1991_v34, 0.0  ;;  %v1992_v56 = vadd.f32 %v1988_v53, %v1839_v36 }
0x1912   :  { %1996 = vadd.xlane.f32.xlu1 %v1995_v55 }
0x1913   :  { %v1998_v58 = vsel %vm151_vm1, %v1992_v56, 0.0 }
0x1914   :  { %1999 = vadd.xlane.f32.xlu0 %v1998_v58 }
0x199f   :  { %v1997_v59 = vpop.xlane.xlu1 %1996 }
0x19a0   :  { %v2001_v60 = vmul.f32 0.03125, %v1997_v59 }
0x19a1   :  { %v2000_v41 = vpop.xlane.xlu0 %1999 }
0x19a2   :  { %v2003_v61 = vsub.f32 %v1991_v34, %v2001_v60  ;;  %v2002_v62 = vmul.f32 0.03125, %v2000_v41 }
0x19a4   :  { %v2004_v63 = vsub.f32 %v1992_v56, %v2002_v62  ;;  %v2005_v44 = vmul.f32 %v2003_v61, %v2003_v61 }
0x19a6   :  { %v2007_v1 = vsel %vm151_vm1, %v2005_v44, 0.0  ;;  %v2006_v5 = vmul.f32 %v2004_v63, %v2004_v63 }
0x19a7   :  { %2008 = vadd.xlane.f32.xlu0 %v2007_v1 }
0x19a8   :  { %v2010_v2 = vsel %vm151_vm1, %v2006_v5, 0.0 }
0x19ab   :  { %2011 = vadd.xlane.f32.xlu0 %v2010_v2 }
0x1a34   :  { %v2009_v6 = vpop.xlane.xlu0 %2008 }
0x1a35   :  { %v2013_v7 = vmul.f32 0.03125, %v2009_v6 }
0x1a37   :  { %v2015_v9 = vadd.f32 1e-05, %v2013_v7 }
0x1a38   :  { %v2012_v10 = vpop.xlane.xlu0 %2011 }
0x1a39   :  { %2472 = vrsqrt.f32 %v2015_v9  ;;  %v2014_v11 = vmul.f32 0.03125, %v2012_v10 }
0x1a3b   :  { %v2016_v14 = vadd.f32 1e-05, %v2014_v11 }
0x1a3d   :  { %2474 = vrsqrt.f32 %v2016_v14 }
0x1a43   :  { %v2473_v15 = vpop.eup %2472 }
0x1a44   :  { %v2019_v17 = vmul.f32 %v2473_v15, %v2003_v61 }
0x1a46   :  { %v2025_v48 = vmul.f32 %v2110_v16, %v2019_v17 }
0x1a47   :  { %v2475_v18 = vpop.eup %2474 }
0x1a48   :  { %v2020_v19 = vmul.f32 %v2475_v18, %v2004_v63  ;;  %v2031_v21 = vadd.f32 %v2111_v47, %v2025_v48 }
0x1a4a   :  { %v2026_v22 = vmul.f32 %v2110_v16, %v2020_v19  ;;  %2033 = vst.msk [vmem:[#allocation13] sm:$0xff] %vm151_vm1, %v2031_v21 }
0x1a4c   :  { %v2032_v23 = vadd.f32 %v2111_v47, %v2026_v22 }
0x1a4e   :  { %2034 = vst.msk [vmem:[#allocation13 + $0x8] sm:$0xff] %vm151_vm1, %v2032_v23 }
0x1a4f   :  { %2619 = shalt.err (!%p2616_p10)
}
0x1a50   :  { %s2620_s24 = scalar_lea.hbm %s3177_s12, 256 }
0x1a51   :  { %p2621_p11 = scmp.ne.s32.totalorder %s3177_s12, %s2620_s24  ;;  %p2624_p12 = scmp.lt.u32.totalorder %s2620_s24, %s3177_s12 }
0x1a53   :  { %p2626_p13 = pnand %p2624_p12, %p2621_p11 }
0x1a55   :  { %2629 = shalt.err (!%p2626_p13)
}
0x1a56   :  { %2046 = dma.vmem_to_hbm [thread:$0]  %s2041_s21, 256, %s3177_s12, [#allocation4], %s2645_s7, %s2645_s7, %s2646_s18  }
0x1a57   :  { %2638 = dma.done.wait [#allocation4], 256  }
0x1a58   :  { %2639 = vsyncadd [#allocation4], 4294967040 }
0x1a59   :  { %2050 = vsyncpa [#allocation3], 1 }
0x1a5a   :  { %2051 = vsyncpa [#allocation6], 1 }
0x1a5b   :  { %2052 = vsyncpa [#allocation9], 1 }
0x1a5c   :  { %2053 = vsyncpa [#allocation12], 1 }
0x1a5d   :  { %2054 = vsyncpa [#allocation4], 1 }

</bundles_post_ra>
